<compile_context>
chip_gen: v6e
topology: v6e:2x2x1
jax: 0.10.0
libtpu: 0.0.40
codegen_flags: <defaults>
</compile_context>

<pallas_src>
import functools

import jax
import jax.numpy as jnp
from jax.experimental import pallas as pl
from jax.experimental.pallas import tpu as pltpu

NEG_SLOPE = 0.01   # default negative_slope of F.leaky_relu
FEAT = 512         # per-backbone feature width -> 3 * 512 = 1536 fused
HID = 1536         # lin1 output width
CAT = 3072         # lin2 input width (1536 fused + 1536 scalar branch)


def _leaky(x):
    return jnp.where(x > 0, x, NEG_SLOPE * x)


# TODO(synk): ResNet18Image / ResNet18Depth / ResNet18Mpt are not defined in the
# reference file; each backbone is stood in by a global-average-pool +
# Linear(C, 512) feature extractor, computed inside the fused kernel.
def _actor_kernel(out_dim,
                  img_ref, dep_ref, mpt_ref, scal_ref,
                  w_rgb_ref, b_rgb_ref, w_dep_ref, b_dep_ref,
                  w_mpt_ref, b_mpt_ref, w1_ref, b1_ref,
                  w2_rgb_ref, w2_dep_ref, w2_mpt_ref, w2_s_ref, b2_ref,
                  o_ref):
    def backbone(x_ref, w_ref, b_ref):
        # x_ref: (TB, C*HW) flat, native dtype.  Global average pool per
        # channel via static lane slices; accumulate in f32.
        c = w_ref.shape[0]
        hw = x_ref.shape[1] // c
        inv_hw = jnp.float32(1.0 / hw)
        feat = b_ref[...]                                    # (1, FEAT) broadcasts
        for ch in range(c):                                  # C is tiny (1 or 3)
            xc = x_ref[:, ch * hw:(ch + 1) * hw].astype(jnp.float32)
            pooled = jnp.sum(xc, axis=-1, keepdims=True) * inv_hw   # (TB, 1)
            feat = feat + pooled * w_ref[ch:ch + 1, :]
        return feat                                          # (TB, FEAT)

    rgb = backbone(img_ref, w_rgb_ref, b_rgb_ref)
    dep = backbone(dep_ref, w_dep_ref, b_dep_ref)
    mpt = backbone(mpt_ref, w_mpt_ref, b_mpt_ref)

    # lin1: K = 3, unrolled MACs (no (TB, 3, HID) intermediate)
    s = scal_ref[...]                                        # (TB, 3)
    lin1 = b1_ref[...]
    for c in range(3):
        lin1 = lin1 + s[:, c:c + 1] * w1_ref[c:c + 1, :]
    # scalar branch: leaky after lin1, then again via the post-concat leaky
    s_act = _leaky(_leaky(lin1))                             # (TB, HID)

    # lin2 decomposed (leaky_relu is elementwise):
    #   leaky(cat([fuse, s_act])) @ w2 ==
    #     leaky(rgb)@w2[:512] + leaky(dep)@w2[512:1024]
    #   + leaky(mpt)@w2[1024:1536] + leaky(leaky(lin1))@w2[1536:]
    def dot_f32(a, w_ref_):
        return jnp.dot(a, w_ref_[...], preferred_element_type=jnp.float32)

    logits = (dot_f32(_leaky(rgb), w2_rgb_ref)
              + dot_f32(_leaky(dep), w2_dep_ref)
              + dot_f32(_leaky(mpt), w2_mpt_ref)
              + dot_f32(s_act, w2_s_ref)
              + b2_ref[...])
    final = _leaky(logits)                                   # (TB, OUT_PAD)

    # softmax(dim=1), masked to the first out_dim lanes of the padded block
    lane = jax.lax.broadcasted_iota(jnp.int32, final.shape, 1)
    mask = lane < out_dim
    masked = jnp.where(mask, final, jnp.float32(-1e30))
    m = jnp.max(masked, axis=1, keepdims=True)
    e = jnp.where(mask, jnp.exp(masked - m), jnp.float32(0.0))
    denom = jnp.sum(e, axis=1, keepdims=True)
    o_ref[...] = e * pl.reciprocal(denom)                    # exact (approx=False)


def _batch_tile(B, row_bytes, budget_bytes=24 << 20):
    """VMEM-budget-aware batch tile (inputs are double-buffered by the pipeline)."""
    if B <= 8 or B % 8 != 0:
        return B                      # full-dim block is always legal
    cap = max(8, int(budget_bytes // (2 * max(row_bytes, 1))))
    cap = min(cap, B)
    if B >= 16:
        cap = min(cap, B // 2)        # >= 2 grid steps so v7x can use both TCs
    t = max(8, (cap // 8) * 8)
    while B % t != 0:
        t -= 8
    return t


def prepare_params(params, out_dim):
    """One-time parameter prep: w2 row-split + lane padding + bias reshapes."""
    out_pad = ((out_dim + 127) // 128) * 128
    out_pad = max(out_pad, 128)
    pad = out_pad - out_dim
    w2 = params["w2"].astype(jnp.float32)
    w2 = jnp.pad(w2, ((0, 0), (0, pad)))                     # zero-pad columns
    b2 = jnp.pad(params["b2"].astype(jnp.float32), ((0, pad),))
    return dict(
        w_rgb=params["w_rgb"].astype(jnp.float32),
        b_rgb=params["b_rgb"].astype(jnp.float32).reshape(1, -1),
        w_dep=params["w_dep"].astype(jnp.float32),
        b_dep=params["b_dep"].astype(jnp.float32).reshape(1, -1),
        w_mpt=params["w_mpt"].astype(jnp.float32),
        b_mpt=params["b_mpt"].astype(jnp.float32).reshape(1, -1),
        w1=params["w1"].astype(jnp.float32),
        b1=params["b1"].astype(jnp.float32).reshape(1, -1),
        w2_rgb=w2[0:FEAT],
        w2_dep=w2[FEAT:2 * FEAT],
        w2_mpt=w2[2 * FEAT:3 * FEAT],
        w2_s=w2[3 * FEAT:CAT],
        b2=b2.reshape(1, -1),
        out_dim=int(out_dim),
        out_pad=int(out_pad),
    )


def actor_net_forward(prepared, img, depth, mpt, local_goal_point, angle):
    B = img.shape[0]
    Ci, HWi = img.shape[1], img.shape[2] * img.shape[3]
    Cd, HWd = depth.shape[1], depth.shape[2] * depth.shape[3]
    Cm, HWm = mpt.shape[1], mpt.shape[2] * mpt.shape[3]
    out_dim = prepared["out_dim"]
    out_pad = prepared["out_pad"]

    # Flat 2-D views, NATIVE dtype (no upcast -> no extra HBM copy, no
    # sublane-padded channel axis in VMEM).
    img2 = img.reshape(B, Ci * HWi)
    dep2 = depth.reshape(B, Cd * HWd)
    mpt2 = mpt.reshape(B, Cm * HWm)
    lgp = local_goal_point.astype(jnp.float32).reshape(-1, 2)
    ang = angle.astype(jnp.float32).reshape(-1, 1)
    scal = jnp.concatenate([lgp, ang], axis=1)               # (B, 3)

    row_bytes = (Ci * HWi * jnp.dtype(img.dtype).itemsize
                 + Cd * HWd * jnp.dtype(depth.dtype).itemsize
                 + Cm * HWm * jnp.dtype(mpt.dtype).itemsize)
    TB = _batch_tile(B, row_bytes)
    grid = (B // TB,)
    _wmap = lambda i: (0, 0)

    in_specs = [
        pl.BlockSpec((TB, Ci * HWi), lambda i: (i, 0)),
        pl.BlockSpec((TB, Cd * HWd), lambda i: (i, 0)),
        pl.BlockSpec((TB, Cm * HWm), lambda i: (i, 0)),
        pl.BlockSpec((TB, 3), lambda i: (i, 0)),
        pl.BlockSpec((Ci, FEAT), _wmap),
        pl.BlockSpec((1, FEAT), _wmap),
        pl.BlockSpec((Cd, FEAT), _wmap),
        pl.BlockSpec((1, FEAT), _wmap),
        pl.BlockSpec((Cm, FEAT), _wmap),
        pl.BlockSpec((1, FEAT), _wmap),
        pl.BlockSpec((3, HID), _wmap),
        pl.BlockSpec((1, HID), _wmap),
        pl.BlockSpec((FEAT, out_pad), _wmap),
        pl.BlockSpec((FEAT, out_pad), _wmap),
        pl.BlockSpec((FEAT, out_pad), _wmap),
        pl.BlockSpec((HID, out_pad), _wmap),
        pl.BlockSpec((1, out_pad), _wmap),
    ]

    out_padded = pl.pallas_call(
        functools.partial(_actor_kernel, out_dim),
        out_shape=jax.ShapeDtypeStruct((B, out_pad), jnp.float32),
        grid=grid,
        in_specs=in_specs,
        out_specs=pl.BlockSpec((TB, out_pad), lambda i: (i, 0)),
        compiler_params=pltpu.CompilerParams(
            dimension_semantics=("parallel",),
            vmem_limit_bytes=48 * 1024 * 1024),
    )(img2, dep2, mpt2, scal,
      prepared["w_rgb"], prepared["b_rgb"],
      prepared["w_dep"], prepared["b_dep"],
      prepared["w_mpt"], prepared["b_mpt"],
      prepared["w1"], prepared["b1"],
      prepared["w2_rgb"], prepared["w2_dep"], prepared["w2_mpt"],
      prepared["w2_s"], prepared["b2"])

    return out_padded[:, :out_dim]


def actor_net_reference(params, img, depth, mpt, local_goal_point, angle):
    """Pure-JAX f32 reference mirroring the original module semantics."""
    def backbone(x, w, b):
        B = x.shape[0]
        pooled = jnp.mean(x.reshape(B, x.shape[1], -1).astype(jnp.float32), axis=-1)
        return pooled @ w + b

    rgb = backbone(img, params["w_rgb"], params["b_rgb"])
    dep = backbone(depth, params["w_dep"], params["b_dep"])
    mpt_f = backbone(mpt, params["w_mpt"], params["b_mpt"])
    fuse = jnp.concatenate([rgb, dep, mpt_f], axis=1)
    lgp = local_goal_point.astype(jnp.float32).reshape(-1, 2)
    ang = angle.astype(jnp.float32).reshape(-1, 1)
    scal = jnp.concatenate([lgp, ang], axis=1)
    s_act = _leaky(scal @ params["w1"] + params["b1"])
    cat = _leaky(jnp.concatenate([fuse, s_act], axis=1))
    final = _leaky(cat @ params["w2"] + params["b2"])
    m = jnp.max(final, axis=1, keepdims=True)
    e = jnp.exp(final - m)
    return e / jnp.sum(e, axis=1, keepdims=True)


def init_params(key, c_rgb, c_dep, c_mpt, out_dim):
    ks = jax.random.split(key, 10)

    def lin(k, fan_in, fan_out):
        scale = 1.0 / jnp.sqrt(jnp.float32(fan_in))
        w = jax.random.uniform(k, (fan_in, fan_out), jnp.float32, -scale, scale)
        b = jnp.zeros((fan_out,), jnp.float32)
        return w, b

    w_rgb, b_rgb = lin(ks[0], c_rgb, FEAT)
    w_dep, b_dep = lin(ks[1], c_dep, FEAT)
    w_mpt, b_mpt = lin(ks[2], c_mpt, FEAT)
    w1, b1 = lin(ks[3], 3, HID)
    w2, b2 = lin(ks[4], CAT, out_dim)
    return dict(w_rgb=w_rgb, b_rgb=b_rgb, w_dep=w_dep, b_dep=b_dep,
                w_mpt=w_mpt, b_mpt=b_mpt, w1=w1, b1=b1, w2=w2, b2=b2)


if __name__ == "__main__":
    key = jax.random.PRNGKey(0)
    k_img, k_dep, k_mpt, k_goal, k_ang, k_par = jax.random.split(key, 6)

    B, H, W = 2, 16, 16
    out_dim = 8
    img = jax.random.normal(k_img, (B, 3, H, W), jnp.float32)    # NCHW
    depth = jax.random.normal(k_dep, (B, 1, H, W), jnp.float32)  # NCHW
    mpt = jax.random.normal(k_mpt, (B, 1, H, W), jnp.float32)    # NCHW
    local_goal_point = jax.random.normal(k_goal, (B, 2), jnp.float32)
    angle = jax.random.normal(k_ang, (B,), jnp.float32)

    params = init_params(k_par, 3, 1, 1, out_dim)
    prepared = prepare_params(params, out_dim)                   # one-time prep

    out = actor_net_forward(prepared, img, depth, mpt, local_goal_point, angle)
    out = jax.block_until_ready(out)

    ref = actor_net_reference(params, img, depth, mpt, local_goal_point, angle)

    assert out.shape == (B, out_dim)
    assert bool(jnp.all(jnp.isfinite(out)))
    assert bool(jnp.allclose(jnp.sum(out, axis=1), 1.0, atol=1e-4))
    assert bool(jnp.allclose(out, ref, atol=1e-3))
    print("KERNEL_OK")
</pallas_src>

<mosaic_0001>
module attributes {stable_mosaic.version = 11 : i64} {
  func.func @_actor_kernel(%arg0: i32, %arg1: memref<2x768xf32, #tpu.memory_space<vmem>>, %arg2: memref<2x256xf32, #tpu.memory_space<vmem>>, %arg3: memref<2x256xf32, #tpu.memory_space<vmem>>, %arg4: memref<2x3xf32, #tpu.memory_space<vmem>>, %arg5: memref<3x512xf32, #tpu.memory_space<vmem>>, %arg6: memref<1x512xf32, #tpu.memory_space<vmem>>, %arg7: memref<1x512xf32, #tpu.memory_space<vmem>>, %arg8: memref<1x512xf32, #tpu.memory_space<vmem>>, %arg9: memref<1x512xf32, #tpu.memory_space<vmem>>, %arg10: memref<1x512xf32, #tpu.memory_space<vmem>>, %arg11: memref<3x1536xf32, #tpu.memory_space<vmem>>, %arg12: memref<1x1536xf32, #tpu.memory_space<vmem>>, %arg13: memref<512x128xf32, #tpu.memory_space<vmem>>, %arg14: memref<512x128xf32, #tpu.memory_space<vmem>>, %arg15: memref<512x128xf32, #tpu.memory_space<vmem>>, %arg16: memref<1536x128xf32, #tpu.memory_space<vmem>>, %arg17: memref<1x128xf32, #tpu.memory_space<vmem>>, %arg18: memref<2x128xf32, #tpu.memory_space<vmem>>) attributes {dimension_semantics = [#tpu.dimension_semantics<parallel>], iteration_bounds = array<i64: 1>, scalar_prefetch = 0 : i64, scratch_operands = 0 : i64, tpu.core_type = #tpu.core_type<tc>, window_params = [{transform_indices = @transform_0, window_bounds = array<i64: 2, 768>}, {transform_indices = @transform_1, window_bounds = array<i64: 2, 256>}, {transform_indices = @transform_2, window_bounds = array<i64: 2, 256>}, {transform_indices = @transform_3, window_bounds = array<i64: 2, 3>}, {pipeline_mode = #tpu.pipeline_mode<synchronous>, transform_indices = @transform_4, window_bounds = array<i64: 3, 512>}, {pipeline_mode = #tpu.pipeline_mode<synchronous>, transform_indices = @transform_5, window_bounds = array<i64: 1, 512>}, {pipeline_mode = #tpu.pipeline_mode<synchronous>, transform_indices = @transform_6, window_bounds = array<i64: 1, 512>}, {pipeline_mode = #tpu.pipeline_mode<synchronous>, transform_indices = @transform_7, window_bounds = array<i64: 1, 512>}, {pipeline_mode = #tpu.pipeline_mode<synchronous>, transform_indices = @transform_8, window_bounds = array<i64: 1, 512>}, {pipeline_mode = #tpu.pipeline_mode<synchronous>, transform_indices = @transform_9, window_bounds = array<i64: 1, 512>}, {pipeline_mode = #tpu.pipeline_mode<synchronous>, transform_indices = @transform_10, window_bounds = array<i64: 3, 1536>}, {pipeline_mode = #tpu.pipeline_mode<synchronous>, transform_indices = @transform_11, window_bounds = array<i64: 1, 1536>}, {pipeline_mode = #tpu.pipeline_mode<synchronous>, transform_indices = @transform_12, window_bounds = array<i64: 512, 128>}, {pipeline_mode = #tpu.pipeline_mode<synchronous>, transform_indices = @transform_13, window_bounds = array<i64: 512, 128>}, {pipeline_mode = #tpu.pipeline_mode<synchronous>, transform_indices = @transform_14, window_bounds = array<i64: 512, 128>}, {pipeline_mode = #tpu.pipeline_mode<synchronous>, transform_indices = @transform_15, window_bounds = array<i64: 1536, 128>}, {pipeline_mode = #tpu.pipeline_mode<synchronous>, transform_indices = @transform_16, window_bounds = array<i64: 1, 128>}, {transform_indices = @transform_17, window_bounds = array<i64: 2, 128>}]} {
    %c0 = arith.constant 0 : index
    %c0_0 = arith.constant 0 : index
    %0 = vector.load %arg6[%c0, %c0_0] : memref<1x512xf32, #tpu.memory_space<vmem>>, vector<1x512xf32>
    %c0_1 = arith.constant 0 : index
    %c0_2 = arith.constant 0 : index
    %1 = vector.load %arg1[%c0_1, %c0_2] : memref<2x768xf32, #tpu.memory_space<vmem>>, vector<2x256xf32>
    %cst = arith.constant dense<0.000000e+00> : vector<2xf32>
    %2 = vector.multi_reduction <add>, %1, %cst [1] : vector<2x256xf32> to vector<2xf32>
    %3 = vector.shape_cast %2 : vector<2xf32> to vector<2x1xf32>
    %cst_3 = arith.constant 3.906250e-03 : f32
    %4 = vector.broadcast %cst_3 : f32 to vector<2x1xf32>
    %5 = arith.mulf %3, %4 : vector<2x1xf32>
    %c0_4 = arith.constant 0 : index
    %c0_5 = arith.constant 0 : index
    %6 = vector.load %arg5[%c0_4, %c0_5] : memref<3x512xf32, #tpu.memory_space<vmem>>, vector<1x512xf32>
    %7 = vector.broadcast %5 : vector<2x1xf32> to vector<2x512xf32>
    %8 = vector.broadcast %6 : vector<1x512xf32> to vector<2x512xf32>
    %9 = arith.mulf %7, %8 : vector<2x512xf32>
    %10 = vector.broadcast %0 : vector<1x512xf32> to vector<2x512xf32>
    %11 = arith.addf %10, %9 : vector<2x512xf32>
    %c0_6 = arith.constant 0 : index
    %c256 = arith.constant 256 : index
    %12 = vector.load %arg1[%c0_6, %c256] : memref<2x768xf32, #tpu.memory_space<vmem>>, vector<2x256xf32>
    %cst_7 = arith.constant dense<0.000000e+00> : vector<2xf32>
    %13 = vector.multi_reduction <add>, %12, %cst_7 [1] : vector<2x256xf32> to vector<2xf32>
    %14 = vector.shape_cast %13 : vector<2xf32> to vector<2x1xf32>
    %cst_8 = arith.constant 3.906250e-03 : f32
    %15 = vector.broadcast %cst_8 : f32 to vector<2x1xf32>
    %16 = arith.mulf %14, %15 : vector<2x1xf32>
    %c1 = arith.constant 1 : index
    %c0_9 = arith.constant 0 : index
    %17 = vector.load %arg5[%c1, %c0_9] : memref<3x512xf32, #tpu.memory_space<vmem>>, vector<1x512xf32>
    %18 = vector.broadcast %16 : vector<2x1xf32> to vector<2x512xf32>
    %19 = vector.broadcast %17 : vector<1x512xf32> to vector<2x512xf32>
    %20 = arith.mulf %18, %19 : vector<2x512xf32>
    %21 = arith.addf %11, %20 : vector<2x512xf32>
    %c0_10 = arith.constant 0 : index
    %c512 = arith.constant 512 : index
    %22 = vector.load %arg1[%c0_10, %c512] : memref<2x768xf32, #tpu.memory_space<vmem>>, vector<2x256xf32>
    %cst_11 = arith.constant dense<0.000000e+00> : vector<2xf32>
    %23 = vector.multi_reduction <add>, %22, %cst_11 [1] : vector<2x256xf32> to vector<2xf32>
    %24 = vector.shape_cast %23 : vector<2xf32> to vector<2x1xf32>
    %cst_12 = arith.constant 3.906250e-03 : f32
    %25 = vector.broadcast %cst_12 : f32 to vector<2x1xf32>
    %26 = arith.mulf %24, %25 : vector<2x1xf32>
    %c2 = arith.constant 2 : index
    %c0_13 = arith.constant 0 : index
    %27 = vector.load %arg5[%c2, %c0_13] : memref<3x512xf32, #tpu.memory_space<vmem>>, vector<1x512xf32>
    %28 = vector.broadcast %26 : vector<2x1xf32> to vector<2x512xf32>
    %29 = vector.broadcast %27 : vector<1x512xf32> to vector<2x512xf32>
    %30 = arith.mulf %28, %29 : vector<2x512xf32>
    %31 = arith.addf %21, %30 : vector<2x512xf32>
    %c0_14 = arith.constant 0 : index
    %c0_15 = arith.constant 0 : index
    %32 = vector.load %arg8[%c0_14, %c0_15] : memref<1x512xf32, #tpu.memory_space<vmem>>, vector<1x512xf32>
    %c0_16 = arith.constant 0 : index
    %c0_17 = arith.constant 0 : index
    %33 = vector.load %arg2[%c0_16, %c0_17] : memref<2x256xf32, #tpu.memory_space<vmem>>, vector<2x256xf32>
    %cst_18 = arith.constant dense<0.000000e+00> : vector<2xf32>
    %34 = vector.multi_reduction <add>, %33, %cst_18 [1] : vector<2x256xf32> to vector<2xf32>
    %35 = vector.shape_cast %34 : vector<2xf32> to vector<2x1xf32>
    %cst_19 = arith.constant 3.906250e-03 : f32
    %36 = vector.broadcast %cst_19 : f32 to vector<2x1xf32>
    %37 = arith.mulf %35, %36 : vector<2x1xf32>
    %c0_20 = arith.constant 0 : index
    %c0_21 = arith.constant 0 : index
    %38 = vector.load %arg7[%c0_20, %c0_21] : memref<1x512xf32, #tpu.memory_space<vmem>>, vector<1x512xf32>
    %39 = vector.broadcast %37 : vector<2x1xf32> to vector<2x512xf32>
    %40 = vector.broadcast %38 : vector<1x512xf32> to vector<2x512xf32>
    %41 = arith.mulf %39, %40 : vector<2x512xf32>
    %42 = vector.broadcast %32 : vector<1x512xf32> to vector<2x512xf32>
    %43 = arith.addf %42, %41 : vector<2x512xf32>
    %c0_22 = arith.constant 0 : index
    %c0_23 = arith.constant 0 : index
    %44 = vector.load %arg10[%c0_22, %c0_23] : memref<1x512xf32, #tpu.memory_space<vmem>>, vector<1x512xf32>
    %c0_24 = arith.constant 0 : index
    %c0_25 = arith.constant 0 : index
    %45 = vector.load %arg3[%c0_24, %c0_25] : memref<2x256xf32, #tpu.memory_space<vmem>>, vector<2x256xf32>
    %cst_26 = arith.constant dense<0.000000e+00> : vector<2xf32>
    %46 = vector.multi_reduction <add>, %45, %cst_26 [1] : vector<2x256xf32> to vector<2xf32>
    %47 = vector.shape_cast %46 : vector<2xf32> to vector<2x1xf32>
    %cst_27 = arith.constant 3.906250e-03 : f32
    %48 = vector.broadcast %cst_27 : f32 to vector<2x1xf32>
    %49 = arith.mulf %47, %48 : vector<2x1xf32>
    %c0_28 = arith.constant 0 : index
    %c0_29 = arith.constant 0 : index
    %50 = vector.load %arg9[%c0_28, %c0_29] : memref<1x512xf32, #tpu.memory_space<vmem>>, vector<1x512xf32>
    %51 = vector.broadcast %49 : vector<2x1xf32> to vector<2x512xf32>
    %52 = vector.broadcast %50 : vector<1x512xf32> to vector<2x512xf32>
    %53 = arith.mulf %51, %52 : vector<2x512xf32>
    %54 = vector.broadcast %44 : vector<1x512xf32> to vector<2x512xf32>
    %55 = arith.addf %54, %53 : vector<2x512xf32>
    %c0_30 = arith.constant 0 : index
    %c0_31 = arith.constant 0 : index
    %56 = vector.load %arg4[%c0_30, %c0_31] : memref<2x3xf32, #tpu.memory_space<vmem>>, vector<2x3xf32>
    %c0_32 = arith.constant 0 : index
    %c0_33 = arith.constant 0 : index
    %57 = vector.load %arg12[%c0_32, %c0_33] : memref<1x1536xf32, #tpu.memory_space<vmem>>, vector<1x1536xf32>
    %58 = vector.extract_strided_slice %56 {offsets = [0, 0], sizes = [2, 1], strides = [1, 1]} : vector<2x3xf32> to vector<2x1xf32>
    %c0_34 = arith.constant 0 : index
    %c0_35 = arith.constant 0 : index
    %59 = vector.load %arg11[%c0_34, %c0_35] : memref<3x1536xf32, #tpu.memory_space<vmem>>, vector<1x1536xf32>
    %60 = vector.broadcast %58 : vector<2x1xf32> to vector<2x1536xf32>
    %61 = vector.broadcast %59 : vector<1x1536xf32> to vector<2x1536xf32>
    %62 = arith.mulf %60, %61 : vector<2x1536xf32>
    %63 = vector.broadcast %57 : vector<1x1536xf32> to vector<2x1536xf32>
    %64 = arith.addf %63, %62 : vector<2x1536xf32>
    %65 = vector.extract_strided_slice %56 {offsets = [0, 1], sizes = [2, 1], strides = [1, 1]} : vector<2x3xf32> to vector<2x1xf32>
    %c1_36 = arith.constant 1 : index
    %c0_37 = arith.constant 0 : index
    %66 = vector.load %arg11[%c1_36, %c0_37] : memref<3x1536xf32, #tpu.memory_space<vmem>>, vector<1x1536xf32>
    %67 = vector.broadcast %65 : vector<2x1xf32> to vector<2x1536xf32>
    %68 = vector.broadcast %66 : vector<1x1536xf32> to vector<2x1536xf32>
    %69 = arith.mulf %67, %68 : vector<2x1536xf32>
    %70 = arith.addf %64, %69 : vector<2x1536xf32>
    %71 = vector.extract_strided_slice %56 {offsets = [0, 2], sizes = [2, 1], strides = [1, 1]} : vector<2x3xf32> to vector<2x1xf32>
    %c2_38 = arith.constant 2 : index
    %c0_39 = arith.constant 0 : index
    %72 = vector.load %arg11[%c2_38, %c0_39] : memref<3x1536xf32, #tpu.memory_space<vmem>>, vector<1x1536xf32>
    %73 = vector.broadcast %71 : vector<2x1xf32> to vector<2x1536xf32>
    %74 = vector.broadcast %72 : vector<1x1536xf32> to vector<2x1536xf32>
    %75 = arith.mulf %73, %74 : vector<2x1536xf32>
    %76 = arith.addf %70, %75 : vector<2x1536xf32>
    %cst_40 = arith.constant 0.000000e+00 : f32
    %77 = vector.broadcast %cst_40 : f32 to vector<2x1536xf32>
    %78 = arith.cmpf ogt, %76, %77 : vector<2x1536xf32>
    %cst_41 = arith.constant 0.00999999977 : f32
    %79 = vector.broadcast %cst_41 : f32 to vector<2x1536xf32>
    %80 = arith.mulf %79, %76 : vector<2x1536xf32>
    %81 = arith.select %78, %76, %80 : vector<2x1536xi1>, vector<2x1536xf32>
    %cst_42 = arith.constant 0.000000e+00 : f32
    %82 = vector.broadcast %cst_42 : f32 to vector<2x1536xf32>
    %83 = arith.cmpf ogt, %81, %82 : vector<2x1536xf32>
    %cst_43 = arith.constant 0.00999999977 : f32
    %84 = vector.broadcast %cst_43 : f32 to vector<2x1536xf32>
    %85 = arith.mulf %84, %81 : vector<2x1536xf32>
    %86 = arith.select %83, %81, %85 : vector<2x1536xi1>, vector<2x1536xf32>
    %cst_44 = arith.constant 0.000000e+00 : f32
    %87 = vector.broadcast %cst_44 : f32 to vector<2x512xf32>
    %88 = arith.cmpf ogt, %31, %87 : vector<2x512xf32>
    %cst_45 = arith.constant 0.00999999977 : f32
    %89 = vector.broadcast %cst_45 : f32 to vector<2x512xf32>
    %90 = arith.mulf %89, %31 : vector<2x512xf32>
    %91 = arith.select %88, %31, %90 : vector<2x512xi1>, vector<2x512xf32>
    %c0_46 = arith.constant 0 : index
    %c0_47 = arith.constant 0 : index
    %92 = vector.load %arg13[%c0_46, %c0_47] : memref<512x128xf32, #tpu.memory_space<vmem>>, vector<512x128xf32>
    %cst_48 = arith.constant dense<0.000000e+00> : vector<2x128xf32>
    %93 = tpu.matmul %91, %92, %cst_48 {dimension_numbers = #tpu.dot_dimension_numbers<[1], [0], [0], [1], [0, 0, 1, 1], [], []>} : vector<2x512xf32>, vector<512x128xf32>, vector<2x128xf32> -> vector<2x128xf32>
    %cst_49 = arith.constant 0.000000e+00 : f32
    %94 = vector.broadcast %cst_49 : f32 to vector<2x512xf32>
    %95 = arith.cmpf ogt, %43, %94 : vector<2x512xf32>
    %cst_50 = arith.constant 0.00999999977 : f32
    %96 = vector.broadcast %cst_50 : f32 to vector<2x512xf32>
    %97 = arith.mulf %96, %43 : vector<2x512xf32>
    %98 = arith.select %95, %43, %97 : vector<2x512xi1>, vector<2x512xf32>
    %c0_51 = arith.constant 0 : index
    %c0_52 = arith.constant 0 : index
    %99 = vector.load %arg14[%c0_51, %c0_52] : memref<512x128xf32, #tpu.memory_space<vmem>>, vector<512x128xf32>
    %cst_53 = arith.constant dense<0.000000e+00> : vector<2x128xf32>
    %100 = tpu.matmul %98, %99, %cst_53 {dimension_numbers = #tpu.dot_dimension_numbers<[1], [0], [0], [1], [0, 0, 1, 1], [], []>} : vector<2x512xf32>, vector<512x128xf32>, vector<2x128xf32> -> vector<2x128xf32>
    %101 = arith.addf %93, %100 : vector<2x128xf32>
    %cst_54 = arith.constant 0.000000e+00 : f32
    %102 = vector.broadcast %cst_54 : f32 to vector<2x512xf32>
    %103 = arith.cmpf ogt, %55, %102 : vector<2x512xf32>
    %cst_55 = arith.constant 0.00999999977 : f32
    %104 = vector.broadcast %cst_55 : f32 to vector<2x512xf32>
    %105 = arith.mulf %104, %55 : vector<2x512xf32>
    %106 = arith.select %103, %55, %105 : vector<2x512xi1>, vector<2x512xf32>
    %c0_56 = arith.constant 0 : index
    %c0_57 = arith.constant 0 : index
    %107 = vector.load %arg15[%c0_56, %c0_57] : memref<512x128xf32, #tpu.memory_space<vmem>>, vector<512x128xf32>
    %cst_58 = arith.constant dense<0.000000e+00> : vector<2x128xf32>
    %108 = tpu.matmul %106, %107, %cst_58 {dimension_numbers = #tpu.dot_dimension_numbers<[1], [0], [0], [1], [0, 0, 1, 1], [], []>} : vector<2x512xf32>, vector<512x128xf32>, vector<2x128xf32> -> vector<2x128xf32>
    %109 = arith.addf %101, %108 : vector<2x128xf32>
    %c0_59 = arith.constant 0 : index
    %c0_60 = arith.constant 0 : index
    %110 = vector.load %arg16[%c0_59, %c0_60] : memref<1536x128xf32, #tpu.memory_space<vmem>>, vector<1536x128xf32>
    %cst_61 = arith.constant dense<0.000000e+00> : vector<2x128xf32>
    %111 = tpu.matmul %86, %110, %cst_61 {dimension_numbers = #tpu.dot_dimension_numbers<[1], [0], [0], [1], [0, 0, 1, 1], [], []>} : vector<2x1536xf32>, vector<1536x128xf32>, vector<2x128xf32> -> vector<2x128xf32>
    %112 = arith.addf %109, %111 : vector<2x128xf32>
    %c0_62 = arith.constant 0 : index
    %c0_63 = arith.constant 0 : index
    %113 = vector.load %arg17[%c0_62, %c0_63] : memref<1x128xf32, #tpu.memory_space<vmem>>, vector<1x128xf32>
    %114 = vector.broadcast %113 : vector<1x128xf32> to vector<2x128xf32>
    %115 = arith.addf %112, %114 : vector<2x128xf32>
    %cst_64 = arith.constant 0.000000e+00 : f32
    %116 = vector.broadcast %cst_64 : f32 to vector<2x128xf32>
    %117 = arith.cmpf ogt, %115, %116 : vector<2x128xf32>
    %cst_65 = arith.constant 0.00999999977 : f32
    %118 = vector.broadcast %cst_65 : f32 to vector<2x128xf32>
    %119 = arith.mulf %118, %115 : vector<2x128xf32>
    %120 = arith.select %117, %115, %119 : vector<2x128xi1>, vector<2x128xf32>
    %121 = tpu.iota {dimensions = array<i32: 1>} : vector<2x128xi32>
    %c8_i32 = arith.constant 8 : i32
    %122 = vector.broadcast %c8_i32 : i32 to vector<2x128xi32>
    %123 = arith.cmpi slt, %121, %122 : vector<2x128xi32>
    %cst_66 = arith.constant -1.000000e+30 : f32
    %124 = vector.broadcast %cst_66 : f32 to vector<2x128xf32>
    %125 = arith.select %123, %120, %124 : vector<2x128xi1>, vector<2x128xf32>
    %cst_67 = arith.constant dense<0xFF800000> : vector<2xf32>
    %126 = vector.multi_reduction <maximumf>, %125, %cst_67 [1] : vector<2x128xf32> to vector<2xf32>
    %127 = vector.shape_cast %126 : vector<2xf32> to vector<2x1xf32>
    %128 = vector.broadcast %127 : vector<2x1xf32> to vector<2x128xf32>
    %129 = arith.subf %125, %128 : vector<2x128xf32>
    %130 = math.exp %129 : vector<2x128xf32>
    %cst_68 = arith.constant 0.000000e+00 : f32
    %131 = vector.broadcast %cst_68 : f32 to vector<2x128xf32>
    %132 = arith.select %123, %130, %131 : vector<2x128xi1>, vector<2x128xf32>
    %cst_69 = arith.constant dense<0.000000e+00> : vector<2xf32>
    %133 = vector.multi_reduction <add>, %132, %cst_69 [1] : vector<2x128xf32> to vector<2xf32>
    %134 = vector.shape_cast %133 : vector<2xf32> to vector<2x1xf32>
    %135 = tpu.reciprocal %134 : vector<2x1xf32> -> vector<2x1xf32>
    %136 = vector.broadcast %135 : vector<2x1xf32> to vector<2x128xf32>
    %137 = arith.mulf %132, %136 : vector<2x128xf32>
    %c0_70 = arith.constant 0 : index
    %c0_71 = arith.constant 0 : index
    %138 = vector.load %arg18[%c0_70, %c0_71] : memref<2x128xf32, #tpu.memory_space<vmem>>, vector<2x128xf32>
    tpu.vector_store %arg18[%c0_70, %c0_71], %137 {strides = array<i32>} : memref<2x128xf32, #tpu.memory_space<vmem>>, vector<2x128xf32>,
    return
  }
  func.func @transform_0(%arg0: i32) -> (i32, i32) {
    %c0_i32 = arith.constant 0 : i32
    %c0_i32_0 = arith.constant 0 : i32
    return %arg0, %c0_i32 : i32, i32
  }
  func.func @transform_1(%arg0: i32) -> (i32, i32) {
    %c0_i32 = arith.constant 0 : i32
    %c0_i32_0 = arith.constant 0 : i32
    return %arg0, %c0_i32 : i32, i32
  }
  func.func @transform_2(%arg0: i32) -> (i32, i32) {
    %c0_i32 = arith.constant 0 : i32
    %c0_i32_0 = arith.constant 0 : i32
    return %arg0, %c0_i32 : i32, i32
  }
  func.func @transform_3(%arg0: i32) -> (i32, i32) {
    %c0_i32 = arith.constant 0 : i32
    %c0_i32_0 = arith.constant 0 : i32
    return %arg0, %c0_i32 : i32, i32
  }
  func.func @transform_4(%arg0: i32) -> (i32, i32) {
    %c0_i32 = arith.constant 0 : i32
    %c0_i32_0 = arith.constant 0 : i32
    %c0_i32_1 = arith.constant 0 : i32
    return %c0_i32, %c0_i32_0 : i32, i32
  }
  func.func @transform_5(%arg0: i32) -> (i32, i32) {
    %c0_i32 = arith.constant 0 : i32
    %c0_i32_0 = arith.constant 0 : i32
    %c0_i32_1 = arith.constant 0 : i32
    return %c0_i32, %c0_i32_0 : i32, i32
  }
  func.func @transform_6(%arg0: i32) -> (i32, i32) {
    %c0_i32 = arith.constant 0 : i32
    %c0_i32_0 = arith.constant 0 : i32
    %c0_i32_1 = arith.constant 0 : i32
    return %c0_i32, %c0_i32_0 : i32, i32
  }
  func.func @transform_7(%arg0: i32) -> (i32, i32) {
    %c0_i32 = arith.constant 0 : i32
    %c0_i32_0 = arith.constant 0 : i32
    %c0_i32_1 = arith.constant 0 : i32
    return %c0_i32, %c0_i32_0 : i32, i32
  }
  func.func @transform_8(%arg0: i32) -> (i32, i32) {
    %c0_i32 = arith.constant 0 : i32
    %c0_i32_0 = arith.constant 0 : i32
    %c0_i32_1 = arith.constant 0 : i32
    return %c0_i32, %c0_i32_0 : i32, i32
  }
  func.func @transform_9(%arg0: i32) -> (i32, i32) {
    %c0_i32 = arith.constant 0 : i32
    %c0_i32_0 = arith.constant 0 : i32
    %c0_i32_1 = arith.constant 0 : i32
    return %c0_i32, %c0_i32_0 : i32, i32
  }
  func.func @transform_10(%arg0: i32) -> (i32, i32) {
    %c0_i32 = arith.constant 0 : i32
    %c0_i32_0 = arith.constant 0 : i32
    %c0_i32_1 = arith.constant 0 : i32
    return %c0_i32, %c0_i32_0 : i32, i32
  }
  func.func @transform_11(%arg0: i32) -> (i32, i32) {
    %c0_i32 = arith.constant 0 : i32
    %c0_i32_0 = arith.constant 0 : i32
    %c0_i32_1 = arith.constant 0 : i32
    return %c0_i32, %c0_i32_0 : i32, i32
  }
  func.func @transform_12(%arg0: i32) -> (i32, i32) {
    %c0_i32 = arith.constant 0 : i32
    %c0_i32_0 = arith.constant 0 : i32
    %c0_i32_1 = arith.constant 0 : i32
    return %c0_i32, %c0_i32_0 : i32, i32
  }
  func.func @transform_13(%arg0: i32) -> (i32, i32) {
    %c0_i32 = arith.constant 0 : i32
    %c0_i32_0 = arith.constant 0 : i32
    %c0_i32_1 = arith.constant 0 : i32
    return %c0_i32, %c0_i32_0 : i32, i32
  }
  func.func @transform_14(%arg0: i32) -> (i32, i32) {
    %c0_i32 = arith.constant 0 : i32
    %c0_i32_0 = arith.constant 0 : i32
    %c0_i32_1 = arith.constant 0 : i32
    return %c0_i32, %c0_i32_0 : i32, i32
  }
  func.func @transform_15(%arg0: i32) -> (i32, i32) {
    %c0_i32 = arith.constant 0 : i32
    %c0_i32_0 = arith.constant 0 : i32
    %c0_i32_1 = arith.constant 0 : i32
    return %c0_i32, %c0_i32_0 : i32, i32
  }
  func.func @transform_16(%arg0: i32) -> (i32, i32) {
    %c0_i32 = arith.constant 0 : i32
    %c0_i32_0 = arith.constant 0 : i32
    %c0_i32_1 = arith.constant 0 : i32
    return %c0_i32, %c0_i32_0 : i32, i32
  }
  func.func @transform_17(%arg0: i32) -> (i32, i32) {
    %c0_i32 = arith.constant 0 : i32
    %c0_i32_0 = arith.constant 0 : i32
    return %arg0, %c0_i32 : i32, i32
  }
}

</mosaic_0001>

<bundles_post_ra>
// kernel: tpu_custom_call.1
= control target key start
LH: loop header
LB: loop body
LE: loop exit
PB: predicated region body
PF: predicated region fallthrough
CT: control target
= control target key end

     0   :  { %s3475_s0 = inlined_call_operand.hbm [shape: f32[2,768], index: 0, kind: input, shape index: {}]   ;;  %s3476_s1 = inlined_call_operand.hbm [shape: f32[2,256], index: 1, kind: input, shape index: {}]   ;;  %s3477_s2 = inlined_call_operand.hbm [shape: f32[2,256], index: 2, kind: input, shape index: {}]   ;;  %s3478_s3 = inlined_call_operand.hbm [shape: f32[2,3], index: 3, kind: input, shape index: {}]   ;;  %s3479_s4 = inlined_call_operand.hbm [shape: f32[3,512], index: 4, kind: input, shape index: {}]   ;;  %s3480_s5 = inlined_call_operand.vmem [shape: f32[1,512], index: 5, kind: input, shape index: {}]   ;;  %s3481_s6 = inlined_call_operand.vmem [shape: f32[1,512], index: 6, kind: input, shape index: {}]   ;;  %s3482_s7 = inlined_call_operand.hbm [shape: f32[1,512], index: 7, kind: input, shape index: {}]   ;;  %s3483_s8 = inlined_call_operand.hbm [shape: f32[1,512], index: 8, kind: input, shape index: {}]   ;;  %s3484_s9 = inlined_call_operand.hbm [shape: f32[1,512], index: 9, kind: input, shape index: {}]   ;;  %s3485_s10 = inlined_call_operand.hbm [shape: f32[3,1536], index: 10, kind: input, shape index: {}]   ;;  %s3486_s11 = inlined_call_operand.vmem [shape: f32[1,1536], index: 11, kind: input, shape index: {}]   ;;  %s3487_s12 = inlined_call_operand.hbm [shape: f32[512,128], index: 12, kind: input, shape index: {}]   ;;  %s3488_s13 = inlined_call_operand.hbm [shape: f32[512,128], index: 13, kind: input, shape index: {}]   ;;  %s3489_s14 = inlined_call_operand.hbm [shape: f32[512,128], index: 14, kind: input, shape index: {}]   ;;  %s3490_s15 = inlined_call_operand.hbm [shape: f32[1536,128], index: 15, kind: input, shape index: {}]   ;;  %s3491_s16 = inlined_call_operand.vmem [shape: f32[1,128], index: 16, kind: input, shape index: {}]   ;;  %s3492_s17 = inlined_call_operand.hbm [shape: f32[2,128], index: 17, kind: output, shape index: {}]  }
   0x1   :  { %3493 = sst [smem:[#allocation32_spill]] %s3475_s0 }
   0x2   :  { %3494 = sst [smem:[#allocation33_spill]] %s3476_s1 }
   0x3   :  { %22 = vsyncpa [#allocation3], 0 }
   0x4   :  { %23 = vsyncpa [#allocation6], 0 }
   0x5   :  { %24 = vsyncpa [#allocation9], 0 }
   0x6   :  { %25 = vsyncpa [#allocation12], 0 }
   0x7   :  { %26 = vsyncpa [#allocation15], 0 }
   0x8   :  { %27 = vsyncpa [#allocation18], 0 }
   0x9   :  { %28 = vsyncpa [#allocation21], 0 }
   0xa   :  { %29 = vsyncpa [#allocation4], 0  ;;  %s3003_s24 = smov [#allocation5]   ;;  %s3004_s26 = smov [#allocation8]  }
   0xb   :  { %s46_s25 = sshll.u32 %s3003_s24, 4  ;;  %s66_s27 = sshll.u32 %s3004_s26, 4  ;;  %s47_s25 = int_to_ptr.vmem [resolvable:$true] %s46_s25  ;;  %s67_s27 = int_to_ptr.vmem [resolvable:$true] %s66_s27 }
   0xc   :  { %s2715_s28 = scalar_lea.vmem %s47_s25, 64  ;;  %p2720_p1 = scmp.lt.s32.totalorder %s47_s25, %s47_s25 }
   0xd   :  { %p2716_p0 = scmp.ne.s32.totalorder %s47_s25, %s2715_s28  ;;  %p2721_p2 = scmp.lt.s32.totalorder %s2715_s28, %s2715_s28 }
   0xf   :  { %p2722_p3 = por %p2721_p2, %p2720_p1 }
  0x11   :  { %p2723_p4 = pnand %p2722_p3, %p2716_p0 }
  0x13   :  { %2726 = shalt.err (!%p2723_p4)
}
  0x14   :  { %s3495_s30 = sld [smem:[#allocation33_spill]]  ;;  %s2735_s18 = scalar_lea.vmem %s67_s27, 32 }
  0x15   :  { %p2736_p5 = scmp.ne.s32.totalorder %s67_s27, %s2735_s18  ;;  %p2740_p6 = scmp.lt.s32.totalorder %s67_s27, %s67_s27 }
  0x16   :  { %p2741_p7 = scmp.lt.s32.totalorder %s2735_s18, %s2735_s18 }
  0x18   :  { %p2742_p8 = por %p2741_p7, %p2740_p6 }
  0x1a   :  { %49 = dma.hbm_to_vmem [thread:$0]  %s3495_s30, 64, %s47_s25, [#allocation6]  }
  0x1b   :  { %p2743_p9 = pnand %p2742_p8, %p2736_p5 }
  0x1d   :  { %2746 = shalt.err (!%p2743_p9)
}
  0x1e   :  { %69 = dma.hbm_to_vmem [thread:$0]  %s3478_s3, 32, %s67_s27, [#allocation9]  }
  0x1f   :  { %s3005_s20 = smov [#allocation11]   ;;  %s3006_s22 = smov [#allocation14]  }
  0x20   :  { %s90_s21 = sshll.u32 %s3005_s20, 4  ;;  %s110_s23 = sshll.u32 %s3006_s22, 4  ;;  %s91_s21 = int_to_ptr.vmem [resolvable:$true] %s90_s21  ;;  %s111_s23 = int_to_ptr.vmem [resolvable:$true] %s110_s23 }
  0x21   :  { %s2755_s24 = scalar_lea.vmem %s91_s21, 64  ;;  %p2760_p11 = scmp.lt.s32.totalorder %s91_s21, %s91_s21 }
  0x22   :  { %p2756_p10 = scmp.ne.s32.totalorder %s91_s21, %s2755_s24  ;;  %p2761_p12 = scmp.lt.s32.totalorder %s2755_s24, %s2755_s24 }
  0x24   :  { %p2762_p13 = por %p2761_p12, %p2760_p11 }
  0x26   :  { %p2763_p0 = pnand %p2762_p13, %p2756_p10 }
  0x28   :  { %2766 = shalt.err (!%p2763_p0)
}
  0x29   :  { %93 = dma.hbm_to_vmem [thread:$0]  %s3482_s7, 64, %s91_s21, [#allocation12]  }
  0x2a   :  { %s2775_s28 = scalar_lea.vmem %s111_s23, 64  ;;  %p2780_p2 = scmp.lt.s32.totalorder %s111_s23, %s111_s23 }
  0x2b   :  { %p2776_p1 = scmp.ne.s32.totalorder %s111_s23, %s2775_s28  ;;  %p2781_p3 = scmp.lt.s32.totalorder %s2775_s28, %s2775_s28 }
  0x2d   :  { %p2782_p4 = por %p2781_p3, %p2780_p2 }
  0x2f   :  { %p2783_p5 = pnand %p2782_p4, %p2776_p1 }
  0x31   :  { %2786 = shalt.err (!%p2783_p5)
}
  0x32   :  { %113 = dma.hbm_to_vmem [thread:$0]  %s3484_s9, 64, %s111_s23, [#allocation15]  }
  0x33   :  { %s3007_s29 = smov [#allocation17]  }
  0x34   :  { %s131_s0 = sshll.u32 %s3007_s29, 4  ;;  %s132_s0 = int_to_ptr.vmem [resolvable:$true] %s131_s0 }
  0x35   :  { %s2795_s30 = scalar_lea.vmem %s132_s0, 8192  ;;  %p2800_p7 = scmp.lt.s32.totalorder %s132_s0, %s132_s0 }
  0x36   :  { %p2796_p6 = scmp.ne.s32.totalorder %s132_s0, %s2795_s30  ;;  %p2801_p8 = scmp.lt.s32.totalorder %s2795_s30, %s2795_s30 }
  0x38   :  { %p2802_p9 = por %p2801_p8, %p2800_p7 }
  0x3a   :  { %p2803_p10 = pnand %p2802_p9, %p2796_p6 }
  0x3c   :  { %2806 = shalt.err (!%p2803_p10)
}
  0x3d   :  { %s3008_s7 = smov 128   ;;  %s3009_s18 = smov 8  }
  0x3e   :  { %137 = dma.hbm_to_vmem [thread:$0]  %s3487_s12, 8192, %s132_s0, [#allocation18], %s3008_s7, %s3008_s7, %s3009_s18  }
  0x3f   :  { %s3010_s9 = smov [#allocation20]   ;;  %s3011_s21 = smov [#allocation2]  }
  0x40   :  { %s155_s20 = sshll.u32 %s3010_s9, 4  ;;  %s36_s22 = sshll.u32 %s3011_s21, 4  ;;  %s156_s20 = int_to_ptr.vmem [resolvable:$true] %s155_s20  ;;  %s37_s22 = int_to_ptr.vmem [resolvable:$true] %s36_s22 }
  0x41   :  { %s2815_s23 = scalar_lea.vmem %s156_s20, 8192  ;;  %p2820_p12 = scmp.lt.s32.totalorder %s156_s20, %s156_s20 }
  0x42   :  { %p2816_p11 = scmp.ne.s32.totalorder %s156_s20, %s2815_s23  ;;  %p2821_p13 = scmp.lt.s32.totalorder %s2815_s23, %s2815_s23 }
  0x44   :  { %p2822_p0 = por %p2821_p13, %p2820_p12 }
  0x46   :  { %p2823_p1 = pnand %p2822_p0, %p2816_p11 }
  0x48   :  { %2826 = shalt.err (!%p2823_p1)
}
  0x49   :  { %161 = dma.hbm_to_vmem [thread:$0]  %s3489_s14, 8192, %s156_s20, [#allocation21], %s3008_s7, %s3008_s7, %s3009_s18  }
  0x4a   :  { %s2835_s12 = scalar_lea.vmem %s37_s22, 192  ;;  %p2840_p3 = scmp.lt.s32.totalorder %s37_s22, %s37_s22 }
  0x4b   :  { %p2836_p2 = scmp.ne.s32.totalorder %s37_s22, %s2835_s12  ;;  %p2841_p4 = scmp.lt.s32.totalorder %s2835_s12, %s2835_s12 }
  0x4d   :  { %p2842_p5 = por %p2841_p4, %p2840_p3 }
  0x4f   :  { %p2843_p6 = pnand %p2842_p5, %p2836_p2 }
  0x51   :  { %2846 = shalt.err (!%p2843_p6)
}
  0x52   :  { %s3496_s3 = sld [smem:[#allocation32_spill]]  ;;  %s3012_s27 = smov [#allocation7]  }
  0x53   :  { %s56_s29 = sshll.u32 %s3012_s27, 4  ;;  %s3013_s0 = smov [#allocation10]   ;;  %s57_s29 = int_to_ptr.vmem [resolvable:$true] %s56_s29 }
  0x54   :  { %s76_s30 = sshll.u32 %s3013_s0, 4  ;;  %s2855_s19 = scalar_lea.vmem %s57_s29, 64  ;;  %s77_s30 = int_to_ptr.vmem [resolvable:$true] %s76_s30 }
  0x55   :  { %p2856_p7 = scmp.ne.s32.totalorder %s57_s29, %s2855_s19  ;;  %p2860_p8 = scmp.lt.s32.totalorder %s57_s29, %s57_s29 }
  0x56   :  { %p2861_p9 = scmp.lt.s32.totalorder %s2855_s19, %s2855_s19 }
  0x58   :  { %39 = dma.hbm_to_vmem [thread:$0]  %s3496_s3, 192, %s37_s22, [#allocation3]  }
  0x59   :  { %p2862_p10 = por %p2861_p9, %p2860_p8 }
  0x5b   :  { %p2863_p11 = pnand %p2862_p10, %p2856_p7 }
  0x5d   :  { %2866 = shalt.err (!%p2863_p11)
}
  0x5e   :  { %59 = dma.hbm_to_vmem [thread:$0]  %s3477_s2, 64, %s57_s29, [#allocation6]  }
  0x5f   :  { %s2875_s9 = scalar_lea.vmem %s77_s30, 256  ;;  %p2880_p13 = scmp.lt.s32.totalorder %s77_s30, %s77_s30 }
  0x60   :  { %p2876_p12 = scmp.ne.s32.totalorder %s77_s30, %s2875_s9  ;;  %p2881_p0 = scmp.lt.s32.totalorder %s2875_s9, %s2875_s9 }
  0x62   :  { %p2882_p1 = por %p2881_p0, %p2880_p13 }
  0x64   :  { %p2883_p2 = pnand %p2882_p1, %p2876_p12 }
  0x66   :  { %2886 = shalt.err (!%p2883_p2)
}
  0x67   :  { %79 = dma.hbm_to_vmem [thread:$0]  %s3479_s4, 256, %s77_s30, [#allocation9]  }
  0x68   :  { %s3014_s22 = smov [#allocation13]   ;;  %s3015_s24 = smov [#allocation16]  }
  0x69   :  { %s100_s23 = sshll.u32 %s3014_s22, 4  ;;  %s120_s25 = sshll.u32 %s3015_s24, 4  ;;  %s101_s23 = int_to_ptr.vmem [resolvable:$true] %s100_s23  ;;  %s121_s25 = int_to_ptr.vmem [resolvable:$true] %s120_s25 }
  0x6a   :  { %s2895_s12 = scalar_lea.vmem %s101_s23, 64  ;;  %p2900_p4 = scmp.lt.s32.totalorder %s101_s23, %s101_s23 }
  0x6b   :  { %p2896_p3 = scmp.ne.s32.totalorder %s101_s23, %s2895_s12  ;;  %p2901_p5 = scmp.lt.s32.totalorder %s2895_s12, %s2895_s12 }
  0x6d   :  { %p2902_p6 = por %p2901_p5, %p2900_p4 }
  0x6f   :  { %p2903_p7 = pnand %p2902_p6, %p2896_p3 }
  0x71   :  { %2906 = shalt.err (!%p2903_p7)
}
  0x72   :  { %103 = dma.hbm_to_vmem [thread:$0]  %s3483_s8, 64, %s101_s23, [#allocation12]  }
  0x73   :  { %s2915_s28 = scalar_lea.vmem %s121_s25, 768  ;;  %p2920_p9 = scmp.lt.s32.totalorder %s121_s25, %s121_s25 }
  0x74   :  { %p2916_p8 = scmp.ne.s32.totalorder %s121_s25, %s2915_s28  ;;  %p2921_p10 = scmp.lt.s32.totalorder %s2915_s28, %s2915_s28 }
  0x76   :  { %p2922_p11 = por %p2921_p10, %p2920_p9 }
  0x78   :  { %p2923_p12 = pnand %p2922_p11, %p2916_p8 }
  0x7a   :  { %2926 = shalt.err (!%p2923_p12)
}
  0x7b   :  { %123 = dma.hbm_to_vmem [thread:$0]  %s3485_s10, 768, %s121_s25, [#allocation15]  }
  0x7c   :  { %s3016_s27 = smov [#allocation19]   ;;  %s3017_s0 = smov [#allocation22]  }
  0x7d   :  { %s143_s29 = sshll.u32 %s3016_s27, 4  ;;  %s167_s30 = sshll.u32 %s3017_s0, 4  ;;  %s144_s29 = int_to_ptr.vmem [resolvable:$true] %s143_s29  ;;  %s168_s30 = int_to_ptr.vmem [resolvable:$true] %s167_s30 }
  0x7e   :  { %s2935_s19 = scalar_lea.vmem %s144_s29, 8192  ;;  %p2940_p0 = scmp.lt.s32.totalorder %s144_s29, %s144_s29 }
  0x7f   :  { %p2936_p13 = scmp.ne.s32.totalorder %s144_s29, %s2935_s19  ;;  %p2941_p1 = scmp.lt.s32.totalorder %s2935_s19, %s2935_s19 }
  0x81   :  { %p2942_p2 = por %p2941_p1, %p2940_p0 }
  0x83   :  { %p2943_p3 = pnand %p2942_p2, %p2936_p13 }
  0x85   :  { %2946 = shalt.err (!%p2943_p3)
}
  0x86   :  { %149 = dma.hbm_to_vmem [thread:$0]  %s3488_s13, 8192, %s144_s29, [#allocation18], %s3008_s7, %s3008_s7, %s3009_s18  }
  0x87   :  { %s2955_s10 = scalar_lea.vmem %s168_s30, 24576  ;;  %p2960_p5 = scmp.lt.s32.totalorder %s168_s30, %s168_s30 }
  0x88   :  { %p2956_p4 = scmp.ne.s32.totalorder %s168_s30, %s2955_s10  ;;  %p2961_p6 = scmp.lt.s32.totalorder %s2955_s10, %s2955_s10 }
  0x8a   :  { %p2962_p7 = por %p2961_p6, %p2960_p5 }
  0x8c   :  { %p2963_p8 = pnand %p2962_p7, %p2956_p4 }
  0x8e   :  { %2966 = shalt.err (!%p2963_p8)
}
  0x8f   :  { %173 = dma.hbm_to_vmem [thread:$0]  %s3490_s15, 24576, %s168_s30, [#allocation21], %s3008_s7, %s3008_s7, %s3009_s18  }
  0x90   :  { %2987 = dma.done.wait [#allocation3], 192  }
  0x91   :  { %2988 = vsyncadd [#allocation3], 4294967104 }
  0x92   :  { %2989 = dma.done.wait [#allocation6], 128  }
  0x93   :  { %2990 = vsyncadd [#allocation6], 4294967168 }
  0x94   :  { %2991 = dma.done.wait [#allocation9], 288  }
  0x95   :  { %2992 = vsyncadd [#allocation9], 4294967008 }
  0x96   :  { %2993 = dma.done.wait [#allocation12], 128  }
  0x97   :  { %2994 = vsyncadd [#allocation12], 4294967168 }
  0x98   :  { %2995 = dma.done.wait [#allocation15], 832  }
  0x99   :  { %2996 = vsyncadd [#allocation15], 4294966464 }
  0x9a   :  { %2997 = dma.done.wait [#allocation18], 16384  }
  0x9b   :  { %2998 = vsyncadd [#allocation18], 4294950912 }
  0x9c   :  { %2999 = dma.done.wait [#allocation21], 32768  }
  0x9d   :  { %3000 = vsyncadd [#allocation21], 4294934528  ;;  %v3018_v0 = vmov 0   ;;  %v3019_v1 = vmov 1   ;;  %vm228_vm0 = vcmask 1041408   ;;  %v1062_v6 = vld [vmem:[#allocation19 + $0xf8] sm:$0xff] }
  0x9e   :  { %2699 = vset.pattern.permute.xlu1 %v3018_v0  ;;  %2700 = vset.pattern.permute.xlu0 %v3019_v1  ;;  %v2257_v2 = vld.sshfl [vmem:[#allocation5] sm:$0x33 pattern:$0x76325410]  ;;  %v1094_v10 = vld [vmem:[#allocation19 + $0x1f8] sm:$0xff]  ;;  %v1061_v25 = vld [vmem:[#allocation19 + $0xf0] sm:$0xff] }
  0x9f   :  { %v394_v3 = vcombine.high %v2257_v2, %v2257_v2  ;;  %v397_v4 = vsel %vm228_vm0, %v2257_v2, 0.0  ;;  %v2255_v5 = vld.sshfl [vmem:[#allocation2 + $0x4] sm:$0x33 pattern:$0x76325410]  ;;  %2260 = vmatprep.subr.mxu0 %v1062_v6  ;;  %2295 = vmatprep.subr.mxu1 %v1094_v10  ;;  %v1046_v23 = vld [vmem:[#allocation19 + $0x78] sm:$0xff] }
  0xa0   :  { %v295_v7 = vcombine.high %v2255_v5, %v2255_v5  ;;  %v298_v8 = vsel %vm228_vm0, %v2255_v5, 0.0  ;;  %v2254_v9 = vld.sshfl [vmem:[#allocation2] sm:$0x33 pattern:$0x76325410]  ;;  %2261 = vmatpush3.msra.mxu0 %v1046_v23  ;;  %v1093_v28 = vld [vmem:[#allocation19 + $0x1f0] sm:$0xff] }
  0xa1   :  { %v398_v11 = vsel %vm228_vm0, %v394_v3, 0.0  ;;  %v225_v12 = vcombine.high %v2254_v9, %v2254_v9  ;;  %v229_v13 = vsel %vm228_vm0, %v2254_v9, 0.0  ;;  %v2256_v14 = vld.sshfl [vmem:[#allocation2 + $0x8] sm:$0x33 pattern:$0x76325410]  ;;  %2262 = vmatprep.subr.mxu0 %v1061_v25 }
  0xa2   :  { %v399_v15 = vadd.f32 %v398_v11, %v397_v4  ;;  %v299_v16 = vsel %vm228_vm0, %v295_v7, 0.0  ;;  %v344_v17 = vcombine.high %v2256_v14, %v2256_v14  ;;  %v347_v18 = vsel %vm228_vm0, %v2256_v14, 0.0  ;;  %v2258_v19 = vld.sshfl [vmem:[#allocation7] sm:$0x33 pattern:$0x76325410] }
  0xa3   :  { %v300_v20 = vadd.f32 %v299_v16, %v298_v8  ;;  %v230_v21 = vsel %vm228_vm0, %v225_v12, 0.0  ;;  %v464_v22 = vcombine.high %v2258_v19, %v2258_v19  ;;  %v1078_v24 = vld [vmem:[#allocation19 + $0x178] sm:$0xff]  ;;  %v1045_v29 = vld [vmem:[#allocation19 + $0x70] sm:$0xff]  ;;  %v467_v32 = vsel %vm228_vm0, %v2258_v19, 0.0  ;;  %v1060_v34 = vld [vmem:[#allocation19 + $0xe8] sm:$0xff] }
  0xa4   :  { %400 = vadd.xlane.f32.xlu0 %v399_v15  ;;  %v231_v26 = vadd.f32 %v230_v21, %v229_v13  ;;  %v348_v27 = vsel %vm228_vm0, %v344_v17, 0.0  ;;  %v1077_v30 = vld [vmem:[#allocation19 + $0x170] sm:$0xff]  ;;  %2296 = vmatpush3.msra.mxu1 %v1078_v24  ;;  %v1092_v35 = vld [vmem:[#allocation19 + $0x1e8] sm:$0xff]  ;;  %v1059_v39 = vld [vmem:[#allocation19 + $0xe0] sm:$0xff]  ;;  %v3020_v16 = vmov 2  }
  0xa5   :  { %301 = vadd.xlane.f32.xlu1 %v300_v20  ;;  %v349_v31 = vadd.f32 %v348_v27, %v347_v18  ;;  %v468_v33 = vsel %vm228_vm0, %v464_v22, 0.0  ;;  %2297 = vmatprep.subr.mxu1 %v1093_v28  ;;  %v1044_v36 = vld [vmem:[#allocation19 + $0x68] sm:$0xff]  ;;  %v1091_v40 = vld [vmem:[#allocation19 + $0x1e0] sm:$0xff]  ;;  %v1058_v43 = vld [vmem:[#allocation19 + $0xd8] sm:$0xff] }
  0xa6   :  { %2263 = vmatpush3.msra.mxu0 %v1045_v29  ;;  %2298 = vmatpush3.msra.mxu1 %v1077_v30  ;;  %v1076_v37 = vld [vmem:[#allocation19 + $0x168] sm:$0xff]  ;;  %v469_v38 = vadd.f32 %v468_v33, %v467_v32  ;;  %v1043_v41 = vld [vmem:[#allocation19 + $0x60] sm:$0xff]  ;;  %v1090_v44 = vld [vmem:[#allocation19 + $0x1d8] sm:$0xff] }
  0xa7   :  { %2264 = vmatprep.subr.mxu0 %v1060_v34  ;;  %2299 = vmatprep.subr.mxu1 %v1092_v35  ;;  %v1075_v42 = vld [vmem:[#allocation19 + $0x160] sm:$0xff]  ;;  %v1042_v45 = vld [vmem:[#allocation19 + $0x58] sm:$0xff]  ;;  %v1057_v47 = vld [vmem:[#allocation19 + $0xd0] sm:$0xff] }
  0xa8   :  { %232 = vadd.xlane.f32.xlu0 %v231_v26  ;;  %2265 = vmatpush3.msra.mxu0 %v1044_v36  ;;  %v1074_v46 = vld [vmem:[#allocation19 + $0x158] sm:$0xff]  ;;  %v1089_v48 = vld [vmem:[#allocation19 + $0x1d0] sm:$0xff]  ;;  %v1056_v51 = vld [vmem:[#allocation19 + $0xc8] sm:$0xff] }
  0xa9   :  { %350 = vadd.xlane.f32.xlu1 %v349_v31  ;;  %2300 = vmatpush3.msra.mxu1 %v1076_v37  ;;  %v1041_v49 = vld [vmem:[#allocation19 + $0x50] sm:$0xff]  ;;  %v1088_v52 = vld [vmem:[#allocation19 + $0x1c8] sm:$0xff]  ;;  %v1055_v55 = vld [vmem:[#allocation19 + $0xc0] sm:$0xff]  ;;  %v237_v31 = vlaneseq }
  0xaa   :  { %2266 = vmatprep.subr.mxu0 %v1059_v39  ;;  %2301 = vmatprep.subr.mxu1 %v1091_v40  ;;  %v1073_v50 = vld [vmem:[#allocation19 + $0x150] sm:$0xff]  ;;  %v1040_v53 = vld [vmem:[#allocation19 + $0x48] sm:$0xff]  ;;  %v1087_v56 = vld [vmem:[#allocation19 + $0x1c0] sm:$0xff] }
  0xab   :  { %2267 = vmatpush3.msra.mxu0 %v1043_v41  ;;  %2302 = vmatpush3.msra.mxu1 %v1075_v42  ;;  %v1072_v54 = vld [vmem:[#allocation19 + $0x148] sm:$0xff]  ;;  %v1039_v57 = vld [vmem:[#allocation19 + $0x40] sm:$0xff]  ;;  %v1054_v59 = vld [vmem:[#allocation19 + $0xb8] sm:$0xff]  ;;  %v3174_v32 = vshrl.u32 %v237_v31, 7 }
  0xac   :  { %470 = vadd.xlane.f32.xlu0 %v469_v38  ;;  %2268 = vmatprep.subr.mxu0 %v1058_v43  ;;  %v1071_v58 = vld [vmem:[#allocation19 + $0x140] sm:$0xff]  ;;  %v1086_v60 = vld [vmem:[#allocation19 + $0x1b8] sm:$0xff]  ;;  %v1053_v63 = vld [vmem:[#allocation19 + $0xb0] sm:$0xff] }
  0xad   :  { %2303 = vmatprep.subr.mxu1 %v1090_v44  ;;  %2269 = vmatpush3.msra.mxu0 %v1042_v45  ;;  %v1038_v61 = vld [vmem:[#allocation19 + $0x38] sm:$0xff]  ;;  %v1085_v0 = vld [vmem:[#allocation19 + $0x1b0] sm:$0xff]  ;;  %v1052_v3 = vld [vmem:[#allocation19 + $0xa8] sm:$0xff]  ;;  %v3177_v33 = vsub.s32 1, %v3174_v32  ;;  %v3180_v34 = vsub.s32 3, %v3174_v32  ;;  %v3183_v35 = vsub.s32 0, %v3174_v32 }
  0xae   :  { %2304 = vmatpush3.msra.mxu1 %v1074_v46  ;;  %2270 = vmatprep.subr.mxu0 %v1057_v47  ;;  %v1070_v62 = vld [vmem:[#allocation19 + $0x138] sm:$0xff]  ;;  %v1037_v1 = vld [vmem:[#allocation19 + $0x30] sm:$0xff]  ;;  %v1084_v5 = vld [vmem:[#allocation19 + $0x1a8] sm:$0xff]  ;;  %v3186_v36 = vsub.s32 2, %v3174_v32 }
  0xaf   :  { %2305 = vmatprep.subr.mxu1 %v1089_v48  ;;  %2271 = vmatpush3.msra.mxu0 %v1041_v49  ;;  %v1069_v2 = vld [vmem:[#allocation19 + $0x130] sm:$0xff]  ;;  %v1036_v6 = vld [vmem:[#allocation19 + $0x28] sm:$0xff]  ;;  %v1051_v8 = vld [vmem:[#allocation19 + $0xa0] sm:$0xff] }
  0xb0   :  { %2306 = vmatpush3.msra.mxu1 %v1073_v50  ;;  %2272 = vmatprep.subr.mxu0 %v1056_v51  ;;  %v524_v4 = vld [vmem:[#allocation8] sm:$0x3]  ;;  %v1068_v7 = vld [vmem:[#allocation19 + $0x128] sm:$0xff]  ;;  %v1083_v9 = vld [vmem:[#allocation19 + $0x1a0] sm:$0xff] }
  0xb1   :  { %2307 = vmatprep.subr.mxu1 %v1088_v52  ;;  %2273 = vmatpush3.msra.mxu0 %v1040_v53  ;;  %v1035_v10 = vld [vmem:[#allocation19 + $0x20] sm:$0xff]  ;;  %v1050_v12 = vld [vmem:[#allocation19 + $0x98] sm:$0xff]  ;;  %v1049_v17 = vld [vmem:[#allocation19 + $0x90] sm:$0xff] }
  0xb2   :  { %2308 = vmatpush3.msra.mxu1 %v1072_v54  ;;  %2274 = vmatprep.subr.mxu0 %v1055_v55  ;;  %v1067_v11 = vld [vmem:[#allocation19 + $0x120] sm:$0xff]  ;;  %v1082_v13 = vld [vmem:[#allocation19 + $0x198] sm:$0xff]  ;;  %v1081_v18 = vld [vmem:[#allocation19 + $0x190] sm:$0xff] }
  0xb3   :  { %2309 = vmatprep.subr.mxu1 %v1087_v56  ;;  %2275 = vmatpush3.msra.mxu0 %v1039_v57  ;;  %v1034_v14 = vld [vmem:[#allocation19 + $0x18] sm:$0xff]  ;;  %v1033_v19 = vld [vmem:[#allocation19 + $0x10] sm:$0xff]  ;;  %v1048_v21 = vld [vmem:[#allocation19 + $0x88] sm:$0xff] }
  0xb4   :  { %2310 = vmatpush3.msra.mxu1 %v1071_v58  ;;  %2276 = vmatprep.subr.mxu0 %v1054_v59  ;;  %v1066_v15 = vld [vmem:[#allocation19 + $0x118] sm:$0xff]  ;;  %v1065_v20 = vld [vmem:[#allocation19 + $0x110] sm:$0xff]  ;;  %v1080_v22 = vld [vmem:[#allocation19 + $0x188] sm:$0xff] }
  0xb5   :  { %2311 = vmatprep.subr.mxu1 %v1086_v60  ;;  %2277 = vmatpush3.msra.mxu0 %v1038_v61  ;;  %v1032_v23 = vld [vmem:[#allocation19 + $0x8] sm:$0xff]  ;;  %v1047_v25 = vld [vmem:[#allocation19 + $0x80] sm:$0xff]  ;;  %v986_v29 = vld [vmem:[#allocation17 + $0xf8] sm:$0xff] }
  0xb6   :  { %2312 = vmatpush3.msra.mxu1 %v1070_v62  ;;  %2278 = vmatprep.subr.mxu0 %v1053_v63  ;;  %v1064_v24 = vld [vmem:[#allocation19 + $0x108] sm:$0xff]  ;;  %v1079_v26 = vld [vmem:[#allocation19 + $0x180] sm:$0xff]  ;;  %v1018_v30 = vld [vmem:[#allocation17 + $0x1f8] sm:$0xff] }
  0xb7   :  { %2313 = vmatprep.subr.mxu1 %v1085_v0  ;;  %2279 = vmatpush3.msra.mxu0 %v1037_v1  ;;  %v1031_v27 = vld [vmem:[#allocation19] sm:$0xff]  ;;  %v970_v63 = vld [vmem:[#allocation17 + $0x78] sm:$0xff] }
  0xb8   :  { %2314 = vmatpush3.msra.mxu1 %v1069_v2  ;;  %2280 = vmatprep.subr.mxu0 %v1052_v3  ;;  %v1063_v28 = vld [vmem:[#allocation19 + $0x100] sm:$0xff]  ;;  %v1002_v0 = vld [vmem:[#allocation17 + $0x178] sm:$0xff] }
  0xb9   :  { %2315 = vmatprep.subr.mxu1 %v1084_v5  ;;  %2281 = vmatpush3.msra.mxu0 %v1036_v6  ;;  %v403_v37 = vld [vmem:[%s3481_s6] sm:$0xf]  ;;  %v384_v38 = vld [vmem:[#allocation11] sm:$0xf]  ;;  %v985_v5 = vld [vmem:[#allocation17 + $0xf0] sm:$0xff] }
  0xba   :  { %532 = vperm.xlu1 %2699, %v524_v4   ;;  %2316 = vmatpush3.msra.mxu1 %v1068_v7  ;;  %v412_v39 = vrot.slane %v403_v37, %v3177_v33  ;;  %v420_v40 = vrot.slane %v403_v37, %v3180_v34  ;;  %v408_v41 = vrot.slane %v403_v37, %v3183_v35  ;;  %v3199_v1 = vld [vmem:[#allocation10] ss:$4 sm:$0xf] }
  0xbb   :  { %2282 = vmatprep.subr.mxu0 %v1051_v8  ;;  %2317 = vmatprep.subr.mxu1 %v1083_v9  ;;  %v416_v42 = vrot.slane %v403_v37, %v3186_v36  ;;  %v437_v44 = vrot.slane %v384_v38, %v3177_v33  ;;  %v445_v46 = vrot.slane %v384_v38, %v3180_v34  ;;  %v1017_v6 = vld [vmem:[#allocation17 + $0x1f0] sm:$0xff] }
  0xbc   :  { %2283 = vmatpush3.msra.mxu0 %v1035_v10  ;;  %2318 = vmatpush3.msra.mxu1 %v1067_v11  ;;  %v433_v47 = vrot.slane %v384_v38, %v3183_v35  ;;  %v441_v48 = vrot.slane %v384_v38, %v3186_v36  ;;  %v969_v7 = vld [vmem:[#allocation17 + $0x70] sm:$0xff]  ;;  %v984_v10 = vld [vmem:[#allocation17 + $0xe8] sm:$0xff] }
  0xbd   :  { %2284 = vmatprep.subr.mxu0 %v1050_v12  ;;  %2319 = vmatprep.subr.mxu1 %v1082_v13  ;;  %v1001_v8 = vld [vmem:[#allocation17 + $0x170] sm:$0xff]  ;;  %v1016_v11 = vld [vmem:[#allocation17 + $0x1e8] sm:$0xff]  ;;  %v244_v13 = vrot.slane %v3199_v1, %v3177_v33 }
  0xbe   :  { %2701 = vset.pattern.permute.xlu1 %v3020_v16  ;;  %2285 = vmatpush3.msra.mxu0 %v1034_v14  ;;  %v968_v12 = vld [vmem:[#allocation17 + $0x68] sm:$0xff] }
  0xbf   :  { %782 = vperm.xlu1 %2701, %v524_v4   ;;  %2320 = vmatpush3.msra.mxu1 %v1066_v15  ;;  %v1000_v15 = vld [vmem:[#allocation17 + $0x168] sm:$0xff] }
  0xc0   :  { %2286 = vmatprep.subr.mxu0 %v1049_v17  ;;  %2321 = vmatprep.subr.mxu1 %v1081_v18  ;;  %v252_v17 = vrot.slane %v3199_v1, %v3180_v34  ;;  %v3212_v18 = vld [vmem:[%s3480_s5] sm:$0xf] }
  0xc1   :  { %2287 = vmatpush3.msra.mxu0 %v1033_v19  ;;  %2322 = vmatpush3.msra.mxu1 %v1065_v20  ;;  %v983_v19 = vld [vmem:[#allocation17 + $0xe0] sm:$0xff] }
  0xc2   :  { %688 = vperm.xlu0 %2700, %v524_v4   ;;  %2288 = vmatprep.subr.mxu0 %v1048_v21  ;;  %v1015_v20 = vld [vmem:[#allocation17 + $0x1e0] sm:$0xff] }
  0xc3   :  { %2323 = vmatprep.subr.mxu1 %v1080_v22  ;;  %2289 = vmatpush3.msra.mxu0 %v1032_v23  ;;  %v967_v21 = vld [vmem:[#allocation17 + $0x60] sm:$0xff]  ;;  %v982_v23 = vld [vmem:[#allocation17 + $0xd8] sm:$0xff] }
  0xc4   :  { %2324 = vmatpush3.msra.mxu1 %v1064_v24  ;;  %2290 = vmatprep.subr.mxu0 %v1047_v25  ;;  %v999_v22 = vld [vmem:[#allocation17 + $0x160] sm:$0xff]  ;;  %v1014_v24 = vld [vmem:[#allocation17 + $0x1d8] sm:$0xff] }
  0xc5   :  { %2325 = vmatprep.subr.mxu1 %v1079_v26  ;;  %2291 = vmatpush3.msra.mxu0 %v1031_v27 }
  0xc6   :  { %2326 = vmatpush3.msra.mxu1 %v1063_v28  ;;  %2330 = vmatprep.subr.mxu0 %v986_v29  ;;  %v269_v28 = vrot.slane %v3212_v18, %v3177_v33  ;;  %v966_v29 = vld [vmem:[#allocation17 + $0x58] sm:$0xff] }
  0xc7   :  { %2365 = vmatprep.subr.mxu1 %v1018_v30  ;;  %2702 = vset.pattern.permute.xlu0 %v3020_v16  ;;  %v3205_v16 = vld [vmem:[#allocation10 + $0x1] ss:$4 sm:$0xf] }
  0xc8   :  { %v314_v25 = vrot.slane %v3205_v16, %v3177_v33  ;;  %v998_v30 = vld [vmem:[#allocation17 + $0x158] sm:$0xff]  ;;  %v322_v37 = vrot.slane %v3205_v16, %v3180_v34 }
 0x12d   :  { %v401_v43 = vpop.xlane.xlu0 %400 }
 0x12e   :  { %v402_v45 = vmul.f32 0.00390625, %v401_v43  ;;  %v302_v9 = vpop.xlane.xlu1 %301  ;;  %v1013_v43 = vld [vmem:[#allocation17 + $0x1d0] sm:$0xff] }
 0x12f   :  { %v3216_v26 = vmul.f32 0.00390625, %v302_v9  ;;  %v962_v9 = vld [vmem:[#allocation17 + $0x38] sm:$0xff] }
 0x130   :  { %v426_v49 = vmul.f32 %v412_v39, %v402_v45  ;;  %v428_v50 = vmul.f32 %v420_v40, %v402_v45  ;;  %v425_v51 = vmul.f32 %v408_v41, %v402_v45  ;;  %v427_v52 = vmul.f32 %v416_v42, %v402_v45  ;;  %v3224_v39 = vld [vmem:[#allocation10 + $0x2] ss:$4 sm:$0xf] }
 0x131   :  { %v233_v2 = vpop.xlane.xlu0 %232  ;;  %v277_v41 = vrot.slane %v3212_v18, %v3180_v34  ;;  %v981_v42 = vld [vmem:[#allocation17 + $0xd0] sm:$0xff] }
 0x132   :  { %v451_v53 = vadd.f32 %v437_v44, %v426_v49  ;;  %v453_v54 = vadd.f32 %v445_v46, %v428_v50  ;;  %v450_v55 = vadd.f32 %v433_v47, %v425_v51  ;;  %v452_v56 = vadd.f32 %v441_v48, %v427_v52  ;;  %v351_v40 = vpop.xlane.xlu1 %350  ;;  %v965_v44 = vld [vmem:[#allocation17 + $0x50] sm:$0xff]  ;;  %v980_v48 = vld [vmem:[#allocation17 + $0xc8] sm:$0xff] }
 0x133   :  { %v3203_v14 = vmul.f32 0.00390625, %v233_v2  ;;  %v997_v45 = vld [vmem:[#allocation17 + $0x150] sm:$0xff]  ;;  %v240_v46 = vrot.slane %v3199_v1, %v3183_v35  ;;  %v248_v47 = vrot.slane %v3199_v1, %v3186_v36  ;;  %v1012_v49 = vld [vmem:[#allocation17 + $0x1c8] sm:$0xff]  ;;  %v328_v50 = vmul.f32 %v314_v25, %v3216_v26 }
 0x134   :  { %vm1020_vm1 = vcmp.gt.f32.partialorder %v451_v53, 0.0  ;;  %v1024_v57 = vmul.f32 0.01, %v451_v53  ;;  %vm1022_vm2 = vcmp.gt.f32.partialorder %v453_v54, 0.0  ;;  %v1026_v58 = vmul.f32 0.01, %v453_v54 }
 0x135   :  { %vm1019_vm3 = vcmp.gt.f32.partialorder %v450_v55, 0.0  ;;  %v1023_v59 = vmul.f32 0.01, %v450_v55  ;;  %vm1021_vm4 = vcmp.gt.f32.partialorder %v452_v56, 0.0  ;;  %v1025_v60 = vmul.f32 0.01, %v452_v56 }
 0x136   :  { %v1028_v61 = vsel %vm1020_vm1, %v451_v53, %v1024_v57  ;;  %v1030_v62 = vsel %vm1022_vm2, %v453_v54, %v1026_v58  ;;  %v258_v27 = vmul.f32 %v244_v13, %v3203_v14  ;;  %v260_v38 = vmul.f32 %v252_v17, %v3203_v14  ;;  %v964_v54 = vld [vmem:[#allocation17 + $0x48] sm:$0xff] }
 0x137   :  { %1159 = vmatprep.mubr.f32.mxu0 %v1028_v61  ;;  %1229 = vmatprep.mubr.f32.mxu1 %v1030_v62  ;;  %v1027_v3 = vsel %vm1019_vm3, %v450_v55, %v1023_v59  ;;  %v1029_v4 = vsel %vm1021_vm4, %v452_v56, %v1025_v60  ;;  %v3233_v51 = vmul.f32 0.00390625, %v351_v40  ;;  %v363_v53 = vrot.slane %v3224_v39, %v3177_v33  ;;  %v996_v55 = vld [vmem:[#allocation17 + $0x148] sm:$0xff]  ;;  %v979_v59 = vld [vmem:[#allocation17 + $0xc0] sm:$0xff] }
 0x138   :  { %1160 = vmatmul.mubr.f32.vlgmr.msra.gmra.mxu0 %v1027_v3  ;;  %1230 = vmatmul.mubr.f32.vlgmr.msra.gmra.mxu1 %v1029_v4  ;;  %v283_v52 = vadd.f32 %v269_v28, %v258_v27  ;;  %v330_v56 = vmul.f32 %v322_v37, %v3216_v26  ;;  %v285_v57 = vadd.f32 %v277_v41, %v260_v38  ;;  %v1011_v60 = vld [vmem:[#allocation17 + $0x1c0] sm:$0xff]  ;;  %v960_v27 = vld [vmem:[#allocation17 + $0x28] sm:$0xff] }
 0x139   :  { %2331 = vmatpush3.msra.mxu0 %v970_v63  ;;  %2366 = vmatpush3.msra.mxu1 %v1002_v0  ;;  %v371_v58 = vrot.slane %v3224_v39, %v3180_v34  ;;  %v310_v61 = vrot.slane %v3205_v16, %v3183_v35  ;;  %v318_v62 = vrot.slane %v3205_v16, %v3186_v36  ;;  %v963_v3 = vld [vmem:[#allocation17 + $0x40] sm:$0xff]  ;;  %v992_v28 = vld [vmem:[#allocation17 + $0x128] sm:$0xff] }
 0x13a   :  { %2332 = vmatprep.subr.mxu0 %v985_v5  ;;  %2367 = vmatprep.subr.mxu1 %v1017_v6  ;;  %v265_v63 = vrot.slane %v3212_v18, %v3183_v35  ;;  %v257_v0 = vmul.f32 %v240_v46, %v3203_v14  ;;  %v259_v1 = vmul.f32 %v248_v47, %v3203_v14  ;;  %v995_v4 = vld [vmem:[#allocation17 + $0x140] sm:$0xff]  ;;  %v978_v5 = vld [vmem:[#allocation17 + $0xb8] sm:$0xff]  ;;  %v977_v14 = vld [vmem:[#allocation17 + $0xb0] sm:$0xff] }
 0x13b   :  { %2333 = vmatpush3.msra.mxu0 %v969_v7  ;;  %2368 = vmatpush3.msra.mxu1 %v1001_v8  ;;  %v273_v2 = vrot.slane %v3212_v18, %v3186_v36  ;;  %v1010_v6 = vld [vmem:[#allocation17 + $0x1b8] sm:$0xff]  ;;  %v332_v7 = vadd.f32 %v328_v50, %v283_v52  ;;  %v377_v8 = vmul.f32 %v363_v53, %v3233_v51  ;;  %v1007_v37 = vld [vmem:[#allocation17 + $0x1a0] sm:$0xff]  ;;  %v1005_v50 = vld [vmem:[#allocation17 + $0x190] sm:$0xff] }
 0x13c   :  { %2334 = vmatprep.subr.mxu0 %v984_v10  ;;  %2369 = vmatprep.subr.mxu1 %v1016_v11  ;;  %v994_v10 = vld [vmem:[#allocation17 + $0x138] sm:$0xff]  ;;  %v334_v11 = vadd.f32 %v330_v56, %v285_v57  ;;  %v327_v13 = vmul.f32 %v310_v61, %v3216_v26  ;;  %v359_v16 = vrot.slane %v3224_v39, %v3183_v35  ;;  %v991_v40 = vld [vmem:[#allocation17 + $0x120] sm:$0xff]  ;;  %v989_v52 = vld [vmem:[#allocation17 + $0x110] sm:$0xff] }
 0x13d   :  { %2335 = vmatpush3.msra.mxu0 %v968_v12  ;;  %2370 = vmatpush3.msra.mxu1 %v1000_v15  ;;  %v379_v12 = vmul.f32 %v371_v58, %v3233_v51  ;;  %v1009_v15 = vld [vmem:[#allocation17 + $0x1b0] sm:$0xff]  ;;  %v367_v17 = vrot.slane %v3224_v39, %v3186_v36  ;;  %v329_v18 = vmul.f32 %v318_v62, %v3216_v26  ;;  %v975_v26 = vld [vmem:[#allocation17 + $0xa0] sm:$0xff]  ;;  %v958_v46 = vld [vmem:[#allocation17 + $0x18] sm:$0xff] }
 0x13e   :  { %2336 = vmatprep.subr.mxu0 %v983_v19  ;;  %2371 = vmatprep.subr.mxu1 %v1015_v20  ;;  %v282_v19 = vadd.f32 %v265_v63, %v257_v0  ;;  %v284_v20 = vadd.f32 %v273_v2, %v259_v1  ;;  %v381_v25 = vadd.f32 %v377_v8, %v332_v7  ;;  %v959_v39 = vld [vmem:[#allocation17 + $0x20] sm:$0xff]  ;;  %v990_v47 = vld [vmem:[#allocation17 + $0x118] sm:$0xff]  ;;  %v1004_v57 = vld [vmem:[#allocation17 + $0x188] sm:$0xff] }
 0x13f   :  { %2337 = vmatpush3.msra.mxu0 %v967_v21  ;;  %2372 = vmatpush3.msra.mxu1 %v999_v22  ;;  %v961_v21 = vld [vmem:[#allocation17 + $0x30] sm:$0xff]  ;;  %v378_v38 = vmul.f32 %v367_v17, %v3233_v51  ;;  %v971_v61 = vld [vmem:[#allocation17 + $0x80] sm:$0xff]  ;;  %v1402_v7 = vld [vmem:[#allocation20 + $0x78] sm:$0xff] }
 0x140   :  { %2338 = vmatprep.subr.mxu0 %v982_v23  ;;  %2373 = vmatprep.subr.mxu1 %v1014_v24  ;;  %v993_v22 = vld [vmem:[#allocation17 + $0x130] sm:$0xff]  ;;  %v976_v23 = vld [vmem:[#allocation17 + $0xa8] sm:$0xff]  ;;  %v331_v41 = vadd.f32 %v327_v13, %v282_v19  ;;  %vm944_vm5 = vcmp.gt.f32.partialorder %v381_v25, 0.0  ;;  %v1003_v62 = vld [vmem:[#allocation17 + $0x180] sm:$0xff] }
 0x141   :  { %2339 = vmatpush3.msra.mxu0 %v966_v29  ;;  %2374 = vmatpush3.msra.mxu1 %v998_v30  ;;  %v1008_v24 = vld [vmem:[#allocation17 + $0x1a8] sm:$0xff]  ;;  %v383_v29 = vadd.f32 %v379_v12, %v334_v11  ;;  %v376_v30 = vmul.f32 %v359_v16, %v3233_v51  ;;  %v957_v51 = vld [vmem:[#allocation17 + $0x10] sm:$0xff]  ;;  %v955_v1 = vld [vmem:[#allocation17] sm:$0xff] }
 0x142   :  { %2340 = vmatprep.subr.mxu0 %v981_v42  ;;  %2375 = vmatprep.subr.mxu1 %v1013_v43  ;;  %v333_v42 = vadd.f32 %v329_v18, %v284_v20  ;;  %v974_v43 = vld [vmem:[#allocation17 + $0x98] sm:$0xff]  ;;  %v987_v2 = vld [vmem:[#allocation17 + $0x100] sm:$0xff]  ;;  %v1401_v11 = vld [vmem:[#allocation20 + $0x70] sm:$0xff] }
 0x143   :  { %2341 = vmatpush3.msra.mxu0 %v965_v44  ;;  %2376 = vmatpush3.msra.mxu1 %v997_v45  ;;  %v1006_v44 = vld [vmem:[#allocation17 + $0x198] sm:$0xff]  ;;  %v948_v45 = vmul.f32 0.01, %v381_v25  ;;  %vm946_vm6 = vcmp.gt.f32.partialorder %v383_v29, 0.0  ;;  %v380_v53 = vadd.f32 %v376_v30, %v331_v41  ;;  %v1433_v12 = vld [vmem:[#allocation20 + $0x170] sm:$0xff]  ;;  %v1416_v13 = vld [vmem:[#allocation20 + $0xe8] sm:$0xff] }
 0x144   :  { %2342 = vmatprep.subr.mxu0 %v980_v48  ;;  %2377 = vmatprep.subr.mxu1 %v1012_v49  ;;  %v950_v48 = vmul.f32 0.01, %v383_v29  ;;  %v973_v49 = vld [vmem:[#allocation17 + $0x90] sm:$0xff]  ;;  %v1434_v8 = vld [vmem:[#allocation20 + $0x178] sm:$0xff]  ;;  %v1432_v16 = vld [vmem:[#allocation20 + $0x168] sm:$0xff] }
 0x145   :  { %2343 = vmatpush3.msra.mxu0 %v964_v54  ;;  %2378 = vmatpush3.msra.mxu1 %v996_v55  ;;  %v382_v54 = vadd.f32 %v378_v38, %v333_v42  ;;  %v972_v55 = vld [vmem:[#allocation17 + $0x88] sm:$0xff]  ;;  %v952_v56 = vsel %vm944_vm5, %v381_v25, %v948_v45  ;;  %v947_v63 = vmul.f32 0.01, %v380_v53  ;;  %vm943_vm7 = vcmp.gt.f32.partialorder %v380_v53, 0.0  ;;  %v1415_v17 = vld [vmem:[#allocation20 + $0xe0] sm:$0xff]  ;;  %v1413_v25 = vld [vmem:[#allocation20 + $0xd0] sm:$0xff] }
 0x146   :  { %2344 = vmatprep.subr.mxu0 %v979_v59  ;;  %2379 = vmatprep.subr.mxu1 %v1011_v60  ;;  %v954_v58 = vsel %vm946_vm6, %v383_v29, %v950_v48  ;;  %v956_v59 = vld [vmem:[#allocation17 + $0x8] sm:$0xff]  ;;  %v1447_v18 = vld [vmem:[#allocation20 + $0x1e0] sm:$0xff]  ;;  %v1429_v29 = vld [vmem:[#allocation20 + $0x150] sm:$0xff] }
 0x147   :  { %2345 = vmatpush3.msra.mxu0 %v963_v3  ;;  %2380 = vmatpush3.msra.mxu1 %v995_v4  ;;  %v988_v60 = vld [vmem:[#allocation17 + $0x108] sm:$0xff]  ;;  %v949_v0 = vmul.f32 0.01, %v382_v54  ;;  %vm945_vm8 = vcmp.gt.f32.partialorder %v382_v54, 0.0  ;;  %v1418_v3 = vld [vmem:[#allocation20 + $0xf8] sm:$0xff]  ;;  %v1399_v19 = vld [vmem:[#allocation20 + $0x60] sm:$0xff] }
 0x148   :  { %2346 = vmatprep.subr.mxu0 %v978_v5  ;;  %2381 = vmatprep.subr.mxu1 %v1010_v6  ;;  %v1450_v4 = vld [vmem:[#allocation20 + $0x1f8] sm:$0xff]  ;;  %v951_v5 = vsel %vm943_vm7, %v380_v53, %v947_v63  ;;  %v1431_v20 = vld [vmem:[#allocation20 + $0x160] sm:$0xff]  ;;  %v473_v30 = vld [vmem:[#allocation13] sm:$0xf] }
 0x149   :  { %2347 = vmatpush3.msra.mxu0 %v962_v9  ;;  %2382 = vmatpush3.msra.mxu1 %v994_v10  ;;  %v953_v6 = vsel %vm945_vm8, %v382_v54, %v949_v0  ;;  %v1417_v9 = vld [vmem:[#allocation20 + $0xf0] sm:$0xff]  ;;  %v1444_v38 = vld [vmem:[#allocation20 + $0x1c8] sm:$0xff]  ;;  %v1411_v41 = vld [vmem:[#allocation20 + $0xc0] sm:$0xff]  ;;  %v490_v48 = vrot.slane %v473_v30, %v3180_v34 }
 0x14a   :  { %2348 = vmatprep.subr.mxu0 %v977_v14  ;;  %2383 = vmatprep.subr.mxu1 %v1009_v15  ;;  %v1449_v10 = vld [vmem:[#allocation20 + $0x1f0] sm:$0xff]  ;;  %v1448_v14 = vld [vmem:[#allocation20 + $0x1e8] sm:$0xff]  ;;  %v1443_v42 = vld [vmem:[#allocation20 + $0x1c0] sm:$0xff] }
 0x14b   :  { %2349 = vmatpush3.msra.mxu0 %v961_v21  ;;  %2384 = vmatpush3.msra.mxu1 %v993_v22  ;;  %v1400_v15 = vld [vmem:[#allocation20 + $0x68] sm:$0xff]  ;;  %v1414_v21 = vld [vmem:[#allocation20 + $0xd8] sm:$0xff]  ;;  %v1395_v45 = vld [vmem:[#allocation20 + $0x40] sm:$0xff] }
 0x14c   :  { %2350 = vmatprep.subr.mxu0 %v976_v23  ;;  %2385 = vmatprep.subr.mxu1 %v1008_v24  ;;  %v1446_v22 = vld [vmem:[#allocation20 + $0x1d8] sm:$0xff]  ;;  %v1409_v53 = vld [vmem:[#allocation20 + $0xb0] sm:$0xff]  ;;  %v1408_v63 = vld [vmem:[#allocation20 + $0xa8] sm:$0xff] }
 0x14d   :  { %2351 = vmatpush3.msra.mxu0 %v960_v27  ;;  %2386 = vmatpush3.msra.mxu1 %v992_v28  ;;  %v1398_v23 = vld [vmem:[#allocation20 + $0x58] sm:$0xff]  ;;  %v1445_v27 = vld [vmem:[#allocation20 + $0x1d0] sm:$0xff]  ;;  %v1440_v0 = vld [vmem:[#allocation20 + $0x1a8] sm:$0xff] }
 0x14e   :  { %2352 = vmatprep.subr.mxu0 %v975_v26  ;;  %2387 = vmatprep.subr.mxu1 %v1007_v37  ;;  %v1430_v24 = vld [vmem:[#allocation20 + $0x158] sm:$0xff]  ;;  %v1397_v28 = vld [vmem:[#allocation20 + $0x50] sm:$0xff]  ;;  %v471_v26 = vpop.xlane.xlu0 %470  ;;  %v1412_v37 = vld [vmem:[#allocation20 + $0xc8] sm:$0xff] }
 0x14f   :  { %2353 = vmatpush3.msra.mxu0 %v959_v39  ;;  %2388 = vmatpush3.msra.mxu1 %v991_v40  ;;  %v1396_v39 = vld [vmem:[#allocation20 + $0x48] sm:$0xff]  ;;  %v1441_v54 = vld [vmem:[#allocation20 + $0x1b0] sm:$0xff] }
 0x150   :  { %2354 = vmatprep.subr.mxu0 %v974_v43  ;;  %2389 = vmatprep.subr.mxu1 %v1006_v44  ;;  %v1428_v40 = vld [vmem:[#allocation20 + $0x148] sm:$0xff]  ;;  %v472_v43 = vmul.f32 0.00390625, %v471_v26  ;;  %v482_v44 = vrot.slane %v473_v30, %v3177_v33 }
 0x151   :  { %2355 = vmatpush3.msra.mxu0 %v958_v46  ;;  %2390 = vmatpush3.msra.mxu1 %v990_v47  ;;  %v1427_v46 = vld [vmem:[#allocation20 + $0x140] sm:$0xff]  ;;  %v3262_v47 = vld [vmem:[#allocation14] sm:$0xf] }
 0x152   :  { %2356 = vmatprep.subr.mxu0 %v973_v49  ;;  %2391 = vmatprep.subr.mxu1 %v1005_v50  ;;  %v1410_v49 = vld [vmem:[#allocation20 + $0xb8] sm:$0xff] }
 0x153   :  { %2357 = vmatpush3.msra.mxu0 %v957_v51  ;;  %2392 = vmatpush3.msra.mxu1 %v989_v52  ;;  %v1442_v50 = vld [vmem:[#allocation20 + $0x1b8] sm:$0xff] }
 0x154   :  { %2358 = vmatprep.subr.mxu0 %v972_v55  ;;  %1299 = vmatprep.mubr.f32.mxu0 %v952_v56  ;;  %v1394_v51 = vld [vmem:[#allocation20 + $0x38] sm:$0xff]  ;;  %v478_v55 = vrot.slane %v473_v30, %v3183_v35  ;;  %v496_v56 = vmul.f32 %v482_v44, %v472_v43 }
 0x155   :  { %2393 = vmatprep.subr.mxu1 %v1004_v57  ;;  %1369 = vmatprep.mubr.f32.mxu1 %v954_v58  ;;  %v1426_v52 = vld [vmem:[#allocation20 + $0x138] sm:$0xff]  ;;  %v507_v57 = vrot.slane %v3262_v47, %v3177_v33  ;;  %v1393_v58 = vld [vmem:[#allocation20 + $0x30] sm:$0xff] }
 0x156   :  { %2359 = vmatpush3.msra.mxu0 %v956_v59  ;;  %2394 = vmatpush3.msra.mxu1 %v988_v60  ;;  %v1425_v59 = vld [vmem:[#allocation20 + $0x130] sm:$0xff]  ;;  %v486_v60 = vrot.slane %v473_v30, %v3186_v36  ;;  %v1420_v30 = vld [vmem:[#allocation20 + $0x108] sm:$0xff] }
 0x157   :  { %2360 = vmatprep.subr.mxu0 %v971_v61  ;;  %2395 = vmatprep.subr.mxu1 %v1003_v62  ;;  %v498_v61 = vmul.f32 %v490_v48, %v472_v43  ;;  %v515_v62 = vrot.slane %v3262_v47, %v3180_v34  ;;  %v1419_v48 = vld [vmem:[#allocation20 + $0x100] sm:$0xff] }
 0x158   :  { %2361 = vmatpush3.msra.mxu0 %v955_v1  ;;  %2396 = vmatpush3.msra.mxu1 %v987_v2  ;;  %v1392_v1 = vld [vmem:[#allocation20 + $0x28] sm:$0xff] }
 0x159   :  { %1300 = vmatmul.mubr.f32.vlgmr.msra.gmra.mxu0 %v951_v5  ;;  %1370 = vmatmul.mubr.f32.vlgmr.msra.gmra.mxu1 %v953_v6  ;;  %v1424_v2 = vld [vmem:[#allocation20 + $0x128] sm:$0xff]  ;;  %v521_v5 = vadd.f32 %v507_v57, %v496_v56  ;;  %v503_v6 = vrot.slane %v3262_v47, %v3183_v35 }
 0x15a   :  { %2400 = vmatprep.subr.mxu0 %v1418_v3  ;;  %2435 = vmatprep.subr.mxu1 %v1450_v4  ;;  %v1407_v3 = vld [vmem:[#allocation20 + $0xa0] sm:$0xff] }
 0x15b   :  { %2401 = vmatpush3.msra.mxu0 %v1402_v7  ;;  %2436 = vmatpush3.msra.mxu1 %v1434_v8  ;;  %v1439_v4 = vld [vmem:[#allocation20 + $0x1a0] sm:$0xff]  ;;  %v511_v7 = vrot.slane %v3262_v47, %v3186_v36  ;;  %v495_v8 = vmul.f32 %v478_v55, %v472_v43  ;;  %vm1376_vm9 = vcmp.gt.f32.partialorder %v521_v5, 0.0  ;;  %v3300_v55 = vpop.permute.xlu0 %688 }
 0x15c   :  { %2402 = vmatprep.subr.mxu0 %v1417_v9  ;;  %2437 = vmatprep.subr.mxu1 %v1449_v10  ;;  %v497_v9 = vmul.f32 %v486_v60, %v472_v43  ;;  %v1391_v10 = vld [vmem:[#allocation20 + $0x20] sm:$0xff] }
 0x15d   :  { %2403 = vmatpush3.msra.mxu0 %v1401_v11  ;;  %2438 = vmatpush3.msra.mxu1 %v1433_v12  ;;  %v1423_v11 = vld [vmem:[#allocation20 + $0x120] sm:$0xff]  ;;  %v523_v12 = vadd.f32 %v515_v62, %v498_v61  ;;  %v1607_v61 = vld [vmem:[#allocation22 + $0x78] sm:$0xff] }
 0x15e   :  { %2404 = vmatprep.subr.mxu0 %v1416_v13  ;;  %2439 = vmatprep.subr.mxu1 %v1448_v14  ;;  %v1406_v13 = vld [vmem:[#allocation20 + $0x98] sm:$0xff]  ;;  %v1387_v47 = vld [vmem:[#allocation20] sm:$0xff] }
 0x15f   :  { %2405 = vmatpush3.msra.mxu0 %v1400_v15  ;;  %2440 = vmatpush3.msra.mxu1 %v1432_v16  ;;  %v1438_v14 = vld [vmem:[#allocation20 + $0x198] sm:$0xff]  ;;  %vm1378_vm10 = vcmp.gt.f32.partialorder %v523_v12, 0.0 }
 0x160   :  { %2406 = vmatprep.subr.mxu0 %v1415_v17  ;;  %2441 = vmatprep.subr.mxu1 %v1447_v18  ;;  %v1390_v15 = vld [vmem:[#allocation20 + $0x18] sm:$0xff]  ;;  %v1405_v17 = vld [vmem:[#allocation20 + $0x90] sm:$0xff] }
 0x161   :  { %2407 = vmatpush3.msra.mxu0 %v1399_v19  ;;  %2442 = vmatpush3.msra.mxu1 %v1431_v20  ;;  %v1422_v16 = vld [vmem:[#allocation20 + $0x118] sm:$0xff]  ;;  %v1437_v18 = vld [vmem:[#allocation20 + $0x190] sm:$0xff]  ;;  %v1380_v19 = vmul.f32 0.01, %v521_v5 }
 0x162   :  { %2408 = vmatprep.subr.mxu0 %v1414_v21  ;;  %2443 = vmatprep.subr.mxu1 %v1446_v22  ;;  %v3275_v20 = vld [vmem:[#allocation16] ss:$4 sm:$0xff]  ;;  %v3302_v56 = vld [vmem:[#allocation16 + $0x2] ss:$4 sm:$0xff] }
 0x163   :  { %2409 = vmatpush3.msra.mxu0 %v1398_v23  ;;  %2444 = vmatpush3.msra.mxu1 %v1430_v24  ;;  %v1389_v21 = vld [vmem:[#allocation20 + $0x10] sm:$0xff]  ;;  %v1382_v23 = vmul.f32 0.01, %v523_v12  ;;  %v520_v24 = vadd.f32 %v503_v6, %v495_v8  ;;  %v544_v26 = vrot.slane %v3275_v20, %v3177_v33  ;;  %v1639_v62 = vld [vmem:[#allocation22 + $0x178] sm:$0xff] }
 0x164   :  { %2410 = vmatprep.subr.mxu0 %v1413_v25  ;;  %2445 = vmatprep.subr.mxu1 %v1445_v27  ;;  %v1421_v22 = vld [vmem:[#allocation20 + $0x110] sm:$0xff]  ;;  %v522_v25 = vadd.f32 %v511_v7, %v497_v9  ;;  %v1404_v27 = vld [vmem:[#allocation20 + $0x88] sm:$0xff]  ;;  %v794_v9 = vrot.slane %v3302_v56, %v3177_v33 }
 0x165   :  { %2411 = vmatpush3.msra.mxu0 %v1397_v28  ;;  %2446 = vmatpush3.msra.mxu1 %v1429_v29  ;;  %v1436_v28 = vld [vmem:[#allocation20 + $0x188] sm:$0xff]  ;;  %v1386_v43 = vsel %vm1378_vm10, %v523_v12, %v1382_v23  ;;  %v1379_v44 = vmul.f32 0.01, %v520_v24  ;;  %vm1375_vm11 = vcmp.gt.f32.partialorder %v520_v24, 0.0  ;;  %v1638_v6 = vld [vmem:[#allocation22 + $0x170] sm:$0xff]  ;;  %v1620_v23 = vld [vmem:[#allocation22 + $0xe0] sm:$0xff] }
 0x166   :  { %2412 = vmatprep.subr.mxu0 %v1412_v37  ;;  %2447 = vmatprep.subr.mxu1 %v1444_v38  ;;  %v1388_v29 = vld [vmem:[#allocation20 + $0x8] sm:$0xff]  ;;  %v1403_v37 = vld [vmem:[#allocation20 + $0x80] sm:$0xff]  ;;  %v1384_v38 = vsel %vm1376_vm9, %v521_v5, %v1380_v19  ;;  %vm1377_vm12 = vcmp.gt.f32.partialorder %v522_v25, 0.0  ;;  %v1606_v5 = vld [vmem:[#allocation22 + $0x70] sm:$0xff] }
 0x167   :  { %2413 = vmatpush3.msra.mxu0 %v1396_v39  ;;  %2448 = vmatpush3.msra.mxu1 %v1428_v40  ;;  %v3280_v39 = vpop.permute.xlu1 %532  ;;  %v3285_v40 = vld [vmem:[%s3486_s11] sm:$0xff]  ;;  %v1653_v12 = vld [vmem:[#allocation22 + $0x1e8] sm:$0xff] }
 0x168   :  { %2414 = vmatprep.subr.mxu0 %v1411_v41  ;;  %2449 = vmatprep.subr.mxu1 %v1443_v42  ;;  %v3287_v41 = vld [vmem:[#allocation16 + $0x1] ss:$4 sm:$0xff]  ;;  %v626_v57 = vrot.slane %v3285_v40, %v3180_v34 }
 0x169   :  { %2415 = vmatpush3.msra.mxu0 %v1395_v45  ;;  %2450 = vmatpush3.msra.mxu1 %v1427_v46  ;;  %v1435_v42 = vld [vmem:[#allocation20 + $0x180] sm:$0xff]  ;;  %v1381_v45 = vmul.f32 0.01, %v522_v25  ;;  %v552_v46 = vrot.slane %v3275_v20, %v3180_v34 }
 0x16a   :  { %2416 = vmatprep.subr.mxu0 %v1410_v49  ;;  %2451 = vmatprep.subr.mxu1 %v1442_v50  ;;  %v3293_v49 = vsub.s32 5, %v3174_v32  ;;  %v598_v50 = vmul.f32 %v544_v26, %v3280_v39 }
 0x16b   :  { %2417 = vmatpush3.msra.mxu0 %v1394_v51  ;;  %2452 = vmatpush3.msra.mxu1 %v1426_v52  ;;  %v618_v51 = vrot.slane %v3285_v40, %v3177_v33  ;;  %v700_v52 = vrot.slane %v3287_v41, %v3177_v33  ;;  %v1385_v60 = vsel %vm1377_vm12, %v522_v25, %v1381_v45 }
 0x16c   :  { %2418 = vmatprep.subr.mxu0 %v1409_v53  ;;  %2453 = vmatprep.subr.mxu1 %v1441_v54  ;;  %v1623_v53 = vld [vmem:[#allocation22 + $0xf8] sm:$0xff]  ;;  %v790_v25 = vrot.slane %v3302_v56, %v3183_v35 }
 0x16d   :  { %2419 = vmatpush3.msra.mxu0 %v1393_v58  ;;  %2454 = vmatpush3.msra.mxu1 %v1425_v59  ;;  %v1655_v54 = vld [vmem:[#allocation22 + $0x1f8] sm:$0xff]  ;;  %v708_v58 = vrot.slane %v3287_v41, %v3180_v34  ;;  %v1383_v59 = vsel %vm1375_vm11, %v520_v24, %v1379_v44  ;;  %v672_v7 = vadd.f32 %v618_v51, %v598_v50  ;;  %v1652_v24 = vld [vmem:[#allocation22 + $0x1e0] sm:$0xff] }
 0x16e   :  { %2420 = vmatprep.subr.mxu0 %v1408_v63  ;;  %2455 = vmatprep.subr.mxu1 %v1440_v0  ;;  %v600_v63 = vmul.f32 %v552_v46, %v3280_v39  ;;  %v1622_v0 = vld [vmem:[#allocation22 + $0xf0] sm:$0xff]  ;;  %v754_v8 = vmul.f32 %v700_v52, %v3300_v55  ;;  %v634_v46 = vrot.slane %v3285_v40, %v3293_v49 }
 0x16f   :  { %2421 = vmatpush3.msra.mxu0 %v1392_v1  ;;  %2456 = vmatpush3.msra.mxu1 %v1424_v2  ;;  %v1654_v1 = vld [vmem:[#allocation22 + $0x1f0] sm:$0xff]  ;;  %v540_v2 = vrot.slane %v3275_v20, %v3183_v35  ;;  %v716_v52 = vrot.slane %v3287_v41, %v3293_v49 }
 0x170   :  { %2422 = vmatprep.subr.mxu0 %v1407_v3  ;;  %2457 = vmatprep.subr.mxu1 %v1439_v4  ;;  %v548_v3 = vrot.slane %v3275_v20, %v3186_v36  ;;  %v560_v4 = vrot.slane %v3275_v20, %v3293_v49  ;;  %v674_v19 = vadd.f32 %v626_v57, %v600_v63 }
 0x171   :  { %2423 = vmatpush3.msra.mxu0 %v1391_v10  ;;  %2458 = vmatpush3.msra.mxu1 %v1423_v11  ;;  %v3321_v10 = vsub.s32 7, %v3174_v32  ;;  %v1621_v11 = vld [vmem:[#allocation22 + $0xe8] sm:$0xff]  ;;  %v766_v26 = vadd.f32 %v754_v8, %v672_v7  ;;  %v597_v44 = vmul.f32 %v540_v2, %v3280_v39 }
 0x172   :  { %2424 = vmatprep.subr.mxu0 %v1406_v13  ;;  %2459 = vmatprep.subr.mxu1 %v1438_v14  ;;  %v3323_v13 = vpop.permute.xlu1 %782  ;;  %v614_v14 = vrot.slane %v3285_v40, %v3183_v35  ;;  %v599_v45 = vmul.f32 %v548_v3, %v3280_v39  ;;  %v602_v57 = vmul.f32 %v560_v4, %v3280_v39  ;;  %v1649_v2 = vld [vmem:[#allocation22 + $0x1c8] sm:$0xff] }
 0x173   :  { %2425 = vmatpush3.msra.mxu0 %v1390_v15  ;;  %2460 = vmatpush3.msra.mxu1 %v1422_v16  ;;  %v696_v15 = vrot.slane %v3287_v41, %v3183_v35  ;;  %v622_v16 = vrot.slane %v3285_v40, %v3186_v36  ;;  %v1633_v7 = vld [vmem:[#allocation22 + $0x148] sm:$0xff] }
 0x174   :  { %2426 = vmatprep.subr.mxu0 %v1405_v17  ;;  %2461 = vmatprep.subr.mxu1 %v1437_v18  ;;  %v1605_v17 = vld [vmem:[#allocation22 + $0x68] sm:$0xff]  ;;  %v671_v3 = vadd.f32 %v614_v14, %v597_v44  ;;  %v818_v14 = vrot.slane %v3302_v56, %v3321_v10  ;;  %v1598_v44 = vld [vmem:[#allocation22 + $0x30] sm:$0xff] }
 0x175   :  { %2427 = vmatpush3.msra.mxu0 %v1389_v21  ;;  %2462 = vmatpush3.msra.mxu1 %v1421_v22  ;;  %v1637_v18 = vld [vmem:[#allocation22 + $0x168] sm:$0xff]  ;;  %v756_v21 = vmul.f32 %v708_v58, %v3300_v55  ;;  %v802_v22 = vrot.slane %v3302_v56, %v3180_v34  ;;  %v642_v58 = vrot.slane %v3285_v40, %v3321_v10 }
 0x176   :  { %2428 = vmatprep.subr.mxu0 %v1404_v27  ;;  %2463 = vmatprep.subr.mxu1 %v1436_v28  ;;  %v704_v27 = vrot.slane %v3287_v41, %v3186_v36  ;;  %v798_v28 = vrot.slane %v3302_v56, %v3186_v36  ;;  %v753_v63 = vmul.f32 %v696_v15, %v3300_v55 }
 0x177   :  { %2429 = vmatpush3.msra.mxu0 %v1388_v29  ;;  %2464 = vmatpush3.msra.mxu1 %v1420_v30  ;;  %v1604_v29 = vld [vmem:[#allocation22 + $0x60] sm:$0xff]  ;;  %v768_v50 = vadd.f32 %v756_v21, %v674_v19  ;;  %v850_v51 = vmul.f32 %v802_v22, %v3323_v13  ;;  %v673_v4 = vadd.f32 %v622_v16, %v599_v45  ;;  %v1630_v45 = vld [vmem:[#allocation22 + $0x130] sm:$0xff] }
 0x178   :  { %2430 = vmatprep.subr.mxu0 %v1403_v37  ;;  %1515 = vmatprep.mubr.f32.mxu0 %v1384_v38  ;;  %v1636_v30 = vld [vmem:[#allocation22 + $0x160] sm:$0xff]  ;;  %v848_v37 = vmul.f32 %v794_v9, %v3323_v13  ;;  %v568_v38 = vrot.slane %v3275_v20, %v3321_v10  ;;  %v810_v9 = vrot.slane %v3302_v56, %v3293_v49  ;;  %v1615_v49 = vld [vmem:[#allocation22 + $0xb8] sm:$0xff] }
 0x179   :  { %2465 = vmatprep.subr.mxu1 %v1435_v42  ;;  %1585 = vmatprep.mubr.f32.mxu1 %v1386_v43  ;;  %v1619_v42 = vld [vmem:[#allocation22 + $0xd8] sm:$0xff]  ;;  %v862_v8 = vadd.f32 %v850_v51, %v768_v50  ;;  %v676_v15 = vadd.f32 %v634_v46, %v602_v57  ;;  %v1600_v16 = vld [vmem:[#allocation22 + $0x40] sm:$0xff]  ;;  %v847_v19 = vmul.f32 %v790_v25, %v3323_v13 }
 0x17a   :  { %2431 = vmatpush3.msra.mxu0 %v1387_v47  ;;  %2466 = vmatpush3.msra.mxu1 %v1419_v48  ;;  %v1651_v43 = vld [vmem:[#allocation22 + $0x1d8] sm:$0xff] }
 0x17b   :  { %1516 = vmatmul.mubr.f32.vlgmr.msra.gmra.mxu0 %v1383_v59  ;;  %1586 = vmatmul.mubr.f32.vlgmr.msra.gmra.mxu1 %v1385_v60  ;;  %v1603_v47 = vld [vmem:[#allocation22 + $0x58] sm:$0xff]  ;;  %v724_v59 = vrot.slane %v3287_v41, %v3321_v10  ;;  %v1602_v60 = vld [vmem:[#allocation22 + $0x50] sm:$0xff]  ;;  %v849_v10 = vmul.f32 %v798_v28, %v3323_v13  ;;  %v886_v25 = vmul.f32 0.01, %v862_v8  ;;  %vm874_vm14 = vcmp.gt.f32.partialorder %v862_v8, 0.0 }
 0x17c   :  { %2470 = vmatprep.subr.mxu0 %v1623_v53  ;;  %2505 = vmatprep.subr.mxu1 %v1655_v54  ;;  %v1635_v48 = vld [vmem:[#allocation22 + $0x158] sm:$0xff]  ;;  %v1618_v53 = vld [vmem:[#allocation22 + $0xd0] sm:$0xff]  ;;  %v854_v28 = vmul.f32 %v818_v14, %v3323_v13 }
 0x17d   :  { %2471 = vmatpush3.msra.mxu0 %v1607_v61  ;;  %2506 = vmatpush3.msra.mxu1 %v1639_v62  ;;  %v1650_v54 = vld [vmem:[#allocation22 + $0x1d0] sm:$0xff]  ;;  %v860_v62 = vadd.f32 %v848_v37, %v766_v26  ;;  %v760_v22 = vmul.f32 %v724_v59, %v3300_v55  ;;  %v1631_v26 = vld [vmem:[#allocation22 + $0x138] sm:$0xff]  ;;  %v898_v57 = vsel %vm874_vm14, %v862_v8, %v886_v25  ;;  %v1644_v59 = vld [vmem:[#allocation22 + $0x1a0] sm:$0xff] }
 0x17e   :  { %2472 = vmatprep.subr.mxu0 %v1622_v0  ;;  %2507 = vmatprep.subr.mxu1 %v1654_v1  ;;  %v1634_v61 = vld [vmem:[#allocation22 + $0x150] sm:$0xff]  ;;  %v604_v0 = vmul.f32 %v568_v38, %v3280_v39  ;;  %v1617_v1 = vld [vmem:[#allocation22 + $0xc8] sm:$0xff]  ;;  %vm910_vm1 = vcmp.gt.f32.partialorder %v898_v57, 0.0  ;;  %v1592_v25 = vld [vmem:[#allocation22] sm:$0xff] }
 0x17f   :  { %2473 = vmatpush3.msra.mxu0 %v1606_v5  ;;  %2508 = vmatpush3.msra.mxu1 %v1638_v6  ;;  %v755_v5 = vmul.f32 %v704_v27, %v3300_v55  ;;  %v1601_v6 = vld [vmem:[#allocation22 + $0x48] sm:$0xff]  ;;  %v765_v27 = vadd.f32 %v753_v63, %v671_v3  ;;  %vm872_vm13 = vcmp.gt.f32.partialorder %v860_v62, 0.0  ;;  %v1614_v37 = vld [vmem:[#allocation22 + $0xb0] sm:$0xff]  ;;  %v1628_v63 = vld [vmem:[#allocation22 + $0x120] sm:$0xff]  ;;  %v922_v3 = vmul.f32 0.01, %v898_v57 }
 0x180   :  { %2474 = vmatprep.subr.mxu0 %v1621_v11  ;;  %2509 = vmatprep.subr.mxu1 %v1653_v12  ;;  %v1616_v11 = vld [vmem:[#allocation22 + $0xc0] sm:$0xff]  ;;  %v678_v21 = vadd.f32 %v642_v58, %v604_v0  ;;  %v1646_v38 = vld [vmem:[#allocation22 + $0x1b0] sm:$0xff]  ;;  %v1611_v0 = vld [vmem:[#allocation22 + $0x98] sm:$0xff] }
 0x181   :  { %2475 = vmatpush3.msra.mxu0 %v1605_v17  ;;  %2510 = vmatpush3.msra.mxu1 %v1637_v18  ;;  %v1648_v12 = vld [vmem:[#allocation22 + $0x1c0] sm:$0xff]  ;;  %v758_v17 = vmul.f32 %v716_v52, %v3300_v55  ;;  %v859_v51 = vadd.f32 %v847_v19, %v765_v27  ;;  %v1610_v8 = vld [vmem:[#allocation22 + $0x90] sm:$0xff] }
 0x182   :  { %2476 = vmatprep.subr.mxu0 %v1620_v23  ;;  %2511 = vmatprep.subr.mxu1 %v1652_v24  ;;  %v1632_v18 = vld [vmem:[#allocation22 + $0x140] sm:$0xff]  ;;  %v1647_v23 = vld [vmem:[#allocation22 + $0x1b8] sm:$0xff]  ;;  %v884_v24 = vmul.f32 0.01, %v860_v62  ;;  %v772_v46 = vadd.f32 %v760_v22, %v678_v21  ;;  %v1626_v14 = vld [vmem:[#allocation22 + $0x110] sm:$0xff] }
 0x183   :  { %2477 = vmatpush3.msra.mxu0 %v1604_v29  ;;  %2512 = vmatpush3.msra.mxu1 %v1636_v30  ;;  %v767_v29 = vadd.f32 %v755_v5, %v673_v4  ;;  %v1599_v30 = vld [vmem:[#allocation22 + $0x38] sm:$0xff]  ;;  %v1612_v58 = vld [vmem:[#allocation22 + $0xa0] sm:$0xff]  ;;  %v883_v4 = vmul.f32 0.01, %v859_v51  ;;  %vm871_vm2 = vcmp.gt.f32.partialorder %v859_v51, 0.0  ;;  %v1609_v21 = vld [vmem:[#allocation22 + $0x88] sm:$0xff] }
 0x184   :  { %2478 = vmatprep.subr.mxu0 %v1619_v42  ;;  %2513 = vmatprep.subr.mxu1 %v1651_v43  ;;  %v770_v42 = vadd.f32 %v758_v17, %v676_v15  ;;  %v852_v43 = vmul.f32 %v810_v9, %v3323_v13  ;;  %v896_v50 = vsel %vm872_vm13, %v860_v62, %v884_v24  ;;  %v1642_v9 = vld [vmem:[#allocation22 + $0x190] sm:$0xff]  ;;  %v1641_v22 = vld [vmem:[#allocation22 + $0x188] sm:$0xff]  ;;  %v1608_v27 = vld [vmem:[#allocation22 + $0x80] sm:$0xff] }
 0x185   :  { %2479 = vmatpush3.msra.mxu0 %v1603_v47  ;;  %2514 = vmatpush3.msra.mxu1 %v1635_v48  ;;  %v1613_v47 = vld [vmem:[#allocation22 + $0xa8] sm:$0xff]  ;;  %v861_v52 = vadd.f32 %v849_v10, %v767_v29  ;;  %vm908_vm15 = vcmp.gt.f32.partialorder %v896_v50, 0.0  ;;  %v920_v62 = vmul.f32 0.01, %v896_v50  ;;  %v1640_v29 = vld [vmem:[#allocation22 + $0x180] sm:$0xff] }
 0x186   :  { %2480 = vmatprep.subr.mxu0 %v1618_v53  ;;  %2515 = vmatprep.subr.mxu1 %v1650_v54  ;;  %v1645_v48 = vld [vmem:[#allocation22 + $0x1a8] sm:$0xff] }
 0x187   :  { %2481 = vmatpush3.msra.mxu0 %v1602_v60  ;;  %2516 = vmatpush3.msra.mxu1 %v1634_v61  ;;  %v1597_v53 = vld [vmem:[#allocation22 + $0x28] sm:$0xff]  ;;  %v1596_v60 = vld [vmem:[#allocation22 + $0x20] sm:$0xff]  ;;  %v864_v61 = vadd.f32 %v852_v43, %v770_v42  ;;  %v885_v5 = vmul.f32 0.01, %v861_v52  ;;  %vm873_vm3 = vcmp.gt.f32.partialorder %v861_v52, 0.0  ;;  %v932_v15 = vsel %vm908_vm15, %v896_v50, %v920_v62  ;;  %v1687_v43 = vld [vmem:[#allocation22 + $0x2f8] sm:$0xff] }
 0x188   :  { %2482 = vmatprep.subr.mxu0 %v1617_v1  ;;  %2517 = vmatprep.subr.mxu1 %v1649_v2  ;;  %v1629_v54 = vld [vmem:[#allocation22 + $0x128] sm:$0xff]  ;;  %v1643_v1 = vld [vmem:[#allocation22 + $0x198] sm:$0xff]  ;;  %v866_v2 = vadd.f32 %v854_v28, %v772_v46  ;;  %v3380_v42 = vsub.s32 4, %v3174_v32  ;;  %v3383_v46 = vsub.s32 6, %v3174_v32 }
 0x189   :  { %2483 = vmatpush3.msra.mxu0 %v1601_v6  ;;  %2518 = vmatpush3.msra.mxu1 %v1633_v7  ;;  %v1595_v6 = vld [vmem:[#allocation22 + $0x18] sm:$0xff]  ;;  %vm876_vm4 = vcmp.gt.f32.partialorder %v864_v61, 0.0  ;;  %v897_v19 = vsel %vm873_vm3, %v861_v52, %v885_v5  ;;  %v1686_v52 = vld [vmem:[#allocation22 + $0x2f0] sm:$0xff] }
 0x18a   :  { %2484 = vmatprep.subr.mxu0 %v1616_v11  ;;  %2519 = vmatprep.subr.mxu1 %v1648_v12  ;;  %v1627_v7 = vld [vmem:[#allocation22 + $0x118] sm:$0xff]  ;;  %v888_v11 = vmul.f32 0.01, %v864_v61  ;;  %v1594_v12 = vld [vmem:[#allocation22 + $0x10] sm:$0xff]  ;;  %v890_v17 = vmul.f32 0.01, %v866_v2  ;;  %v630_v62 = vrot.slane %v3285_v40, %v3380_v42  ;;  %v712_v5 = vrot.slane %v3287_v41, %v3380_v42 }
 0x18b   :  { %2485 = vmatpush3.msra.mxu0 %v1600_v16  ;;  %2520 = vmatpush3.msra.mxu1 %v1632_v18  ;;  %v934_v16 = vsel %vm910_vm1, %v898_v57, %v922_v3  ;;  %v895_v18 = vsel %vm871_vm2, %v859_v51, %v883_v4  ;;  %vm878_vm5 = vcmp.gt.f32.partialorder %v866_v2, 0.0  ;;  %vm909_vm7 = vcmp.gt.f32.partialorder %v897_v19, 0.0  ;;  %v1703_v50 = vld [vmem:[#allocation22 + $0x378] sm:$0xff]  ;;  %v1670_v57 = vld [vmem:[#allocation22 + $0x270] sm:$0xff]  ;;  %v1716_v4 = vld [vmem:[#allocation22 + $0x3e0] sm:$0xff] }
 0x18c   :  { %2486 = vmatprep.subr.mxu0 %v1615_v49  ;;  %2521 = vmatprep.subr.mxu1 %v1647_v23  ;;  %v1593_v49 = vld [vmem:[#allocation22 + $0x8] sm:$0xff]  ;;  %v900_v24 = vsel %vm876_vm4, %v864_v61, %v888_v11  ;;  %v919_v10 = vmul.f32 0.01, %v895_v18  ;;  %vm907_vm6 = vcmp.gt.f32.partialorder %v895_v18, 0.0  ;;  %v1700_v11 = vld [vmem:[#allocation22 + $0x360] sm:$0xff] }
 0x18d   :  { %2487 = vmatpush3.msra.mxu0 %v1599_v30  ;;  %2522 = vmatpush3.msra.mxu1 %v1631_v26  ;;  %v1625_v23 = vld [vmem:[#allocation22 + $0x108] sm:$0xff]  ;;  %v921_v30 = vmul.f32 0.01, %v897_v19  ;;  %v902_v26 = vsel %vm878_vm5, %v866_v2, %v890_v17  ;;  %vm912_vm8 = vcmp.gt.f32.partialorder %v900_v24, 0.0  ;;  %v720_v17 = vrot.slane %v3287_v41, %v3383_v46 }
 0x18e   :  { %2488 = vmatprep.subr.mxu0 %v1614_v37  ;;  %2523 = vmatprep.subr.mxu1 %v1646_v38  ;;  %v1624_v37 = vld [vmem:[#allocation22 + $0x100] sm:$0xff]  ;;  %v924_v38 = vmul.f32 0.01, %v900_v24  ;;  %v931_v28 = vsel %vm907_vm6, %v895_v18, %v919_v10  ;;  %vm914_vm9 = vcmp.gt.f32.partialorder %v902_v26, 0.0  ;;  %v1685_v61 = vld [vmem:[#allocation22 + $0x2e8] sm:$0xff]  ;;  %v814_v18 = vrot.slane %v3302_v56, %v3383_v46 }
 0x18f   :  { %2489 = vmatpush3.msra.mxu0 %v1598_v44  ;;  %2524 = vmatpush3.msra.mxu1 %v1630_v45  ;;  %v1719_v44 = vld [vmem:[#allocation22 + $0x3f8] sm:$0xff]  ;;  %v926_v45 = vmul.f32 0.01, %v902_v26  ;;  %v3396_v2 = vld [vmem:[%s3486_s11 + $0x8] sm:$0xf] }
 0x190   :  { %2490 = vmatprep.subr.mxu0 %v1613_v47  ;;  %2525 = vmatprep.subr.mxu1 %v1645_v48  ;;  %v933_v47 = vsel %vm909_vm7, %v897_v19, %v921_v30  ;;  %v1671_v48 = vld [vmem:[#allocation22 + $0x278] sm:$0xff]  ;;  %v936_v51 = vsel %vm912_vm8, %v900_v24, %v924_v38  ;;  %v650_v19 = vrot.slane %v3396_v2, %v3177_v33 }
 0x191   :  { %2491 = vmatpush3.msra.mxu0 %v1597_v53  ;;  %2526 = vmatpush3.msra.mxu1 %v1629_v54  ;;  %v1718_v53 = vld [vmem:[#allocation22 + $0x3f0] sm:$0xff]  ;;  %v938_v32 = vsel %vm914_vm9, %v902_v26, %v926_v45  ;;  %v658_v24 = vrot.slane %v3396_v2, %v3180_v34 }
 0x192   :  { %2492 = vmatprep.subr.mxu0 %v1612_v58  ;;  %2527 = vmatprep.subr.mxu1 %v1644_v59  ;;  %v3385_v54 = vld [vmem:[#allocation16 + $0x20] ss:$4 sm:$0xf]  ;;  %v556_v59 = vrot.slane %v3275_v20, %v3380_v42 }
 0x193   :  { %2493 = vmatpush3.msra.mxu0 %v1596_v60  ;;  %2528 = vmatpush3.msra.mxu1 %v1628_v63  ;;  %v1702_v58 = vld [vmem:[#allocation22 + $0x370] sm:$0xff]  ;;  %v564_v60 = vrot.slane %v3275_v20, %v3383_v46  ;;  %v1717_v63 = vld [vmem:[#allocation22 + $0x3e8] sm:$0xff]  ;;  %v576_v3 = vrot.slane %v3385_v54, %v3177_v33  ;;  %v1684_v20 = vld [vmem:[#allocation22 + $0x2e0] sm:$0xff] }
 0x194   :  { %2494 = vmatprep.subr.mxu0 %v1611_v0  ;;  %2529 = vmatprep.subr.mxu1 %v1643_v1  ;;  %v1669_v0 = vld [vmem:[#allocation22 + $0x268] sm:$0xff]  ;;  %v1666_v26 = vld [vmem:[#allocation22 + $0x250] sm:$0xff] }
 0x195   :  { %2495 = vmatpush3.msra.mxu0 %v1595_v6  ;;  %2530 = vmatpush3.msra.mxu1 %v1627_v7  ;;  %v1701_v1 = vld [vmem:[#allocation22 + $0x368] sm:$0xff]  ;;  %v638_v6 = vrot.slane %v3285_v40, %v3383_v46  ;;  %v3404_v7 = vld [vmem:[#allocation16 + $0x21] ss:$4 sm:$0xf] }
 0x196   :  { %2496 = vmatprep.subr.mxu0 %v1610_v8  ;;  %2531 = vmatprep.subr.mxu1 %v1642_v9  ;;  %v584_v8 = vrot.slane %v3385_v54, %v3180_v34  ;;  %v1668_v9 = vld [vmem:[#allocation22 + $0x260] sm:$0xff]  ;;  %v1715_v40 = vld [vmem:[#allocation22 + $0x3d8] sm:$0xff]  ;;  %v732_v41 = vrot.slane %v3404_v7, %v3177_v33  ;;  %v740_v30 = vrot.slane %v3404_v7, %v3180_v34  ;;  %v1665_v46 = vld [vmem:[#allocation22 + $0x248] sm:$0xff] }
 0x197   :  { %2497 = vmatpush3.msra.mxu0 %v1594_v12  ;;  %1848 = vmatprep.mubr.f32.mxu0 %v932_v15  ;;  %v601_v12 = vmul.f32 %v556_v59, %v3280_v39  ;;  %v603_v15 = vmul.f32 %v564_v60, %v3280_v39 }
 0x198   :  { %2532 = vmatpush3.msra.mxu1 %v1626_v14  ;;  %1918 = vmatprep.mubr.f32.mxu1 %v934_v16  ;;  %v1683_v14 = vld [vmem:[#allocation22 + $0x2d8] sm:$0xff]  ;;  %v806_v16 = vrot.slane %v3302_v56, %v3380_v42  ;;  %v1682_v56 = vld [vmem:[#allocation22 + $0x2d0] sm:$0xff]  ;;  %v608_v10 = vmul.f32 %v584_v8, %v3280_v39  ;;  %v759_v42 = vmul.f32 %v720_v17, %v3300_v55  ;;  %v1709_v17 = vld [vmem:[#allocation22 + $0x3a8] sm:$0xff] }
 0x199   :  { %2498 = vmatprep.subr.mxu0 %v1609_v21  ;;  %2533 = vmatprep.subr.mxu1 %v1641_v22  ;;  %v1667_v21 = vld [vmem:[#allocation22 + $0x258] sm:$0xff]  ;;  %v677_v38 = vadd.f32 %v638_v6, %v603_v15  ;;  %v1662_v8 = vld [vmem:[#allocation22 + $0x230] sm:$0xff]  ;;  %v1677_v15 = vld [vmem:[#allocation22 + $0x2a8] sm:$0xff] }
 0x19a   :  { %2499 = vmatpush3.msra.mxu0 %v1593_v49  ;;  %2534 = vmatpush3.msra.mxu1 %v1625_v23  ;;  %v1699_v22 = vld [vmem:[#allocation22 + $0x358] sm:$0xff]  ;;  %v606_v49 = vmul.f32 %v576_v3, %v3280_v39 }
 0x19b   :  { %2500 = vmatprep.subr.mxu0 %v1608_v27  ;;  %2535 = vmatprep.subr.mxu1 %v1640_v29  ;;  %v3421_v23 = vld [vmem:[#allocation16 + $0x22] ss:$4 sm:$0xf]  ;;  %v757_v29 = vmul.f32 %v712_v5, %v3300_v55  ;;  %v771_v60 = vadd.f32 %v759_v42, %v677_v38 }
 0x19c   :  { %2501 = vmatpush3.msra.mxu0 %v1592_v25  ;;  %2536 = vmatpush3.msra.mxu1 %v1624_v37  ;;  %v1714_v27 = vld [vmem:[#allocation22 + $0x3d0] sm:$0xff]  ;;  %v675_v37 = vadd.f32 %v630_v62, %v601_v12  ;;  %v826_v45 = vrot.slane %v3421_v23, %v3177_v33  ;;  %v1664_v33 = vld [vmem:[#allocation22 + $0x240] sm:$0xff] }
 0x19d   :  { %1849 = vmatmul.mubr.f32.vlgmr.msra.gmra.mxu0 %v931_v28  ;;  %1919 = vmatmul.mubr.f32.vlgmr.msra.gmra.mxu1 %v933_v47  ;;  %v1698_v25 = vld [vmem:[#allocation22 + $0x350] sm:$0xff]  ;;  %v1697_v28 = vld [vmem:[#allocation22 + $0x348] sm:$0xff]  ;;  %v680_v47 = vadd.f32 %v650_v19, %v606_v49  ;;  %v1708_v19 = vld [vmem:[#allocation22 + $0x3a0] sm:$0xff] }
 0x19e   :  { %2540 = vmatprep.subr.mxu0 %v1687_v43  ;;  %2575 = vmatprep.subr.mxu1 %v1719_v44  ;;  %v1681_v43 = vld [vmem:[#allocation22 + $0x2c8] sm:$0xff]  ;;  %v769_v59 = vadd.f32 %v757_v29, %v675_v37  ;;  %v856_v3 = vmul.f32 %v826_v45, %v3323_v13  ;;  %v1692_v49 = vld [vmem:[#allocation22 + $0x320] sm:$0xff]  ;;  %v1659_v29 = vld [vmem:[#allocation22 + $0x218] sm:$0xff] }
 0x19f   :  { %2541 = vmatpush3.msra.mxu0 %v1671_v48  ;;  %1988 = vmatprep.mubr.f32.mxu0 %v936_v51  ;;  %v1713_v44 = vld [vmem:[#allocation22 + $0x3c8] sm:$0xff]  ;;  %v762_v48 = vmul.f32 %v732_v41, %v3300_v55  ;;  %v1680_v51 = vld [vmem:[#allocation22 + $0x2c0] sm:$0xff]  ;;  %v1658_v38 = vld [vmem:[#allocation22 + $0x210] sm:$0xff] }
 0x1a0   :  { %2576 = vmatpush3.msra.mxu1 %v1703_v50  ;;  %2058 = vmatprep.mubr.f32.mxu1 %v938_v32  ;;  %v834_v50 = vrot.slane %v3421_v23, %v3180_v34  ;;  %v682_v32 = vadd.f32 %v658_v24, %v608_v10  ;;  %v1679_v34 = vld [vmem:[#allocation22 + $0x2b8] sm:$0xff]  ;;  %v1690_v42 = vld [vmem:[#allocation22 + $0x310] sm:$0xff]  ;;  %v1673_v45 = vld [vmem:[#allocation22 + $0x288] sm:$0xff] }
 0x1a1   :  { %2542 = vmatprep.subr.mxu0 %v1686_v52  ;;  %2577 = vmatprep.subr.mxu1 %v1718_v53  ;;  %v1712_v52 = vld [vmem:[#allocation22 + $0x3c0] sm:$0xff]  ;;  %v851_v53 = vmul.f32 %v806_v16, %v3323_v13  ;;  %v774_v62 = vadd.f32 %v762_v48, %v680_v47  ;;  %v1691_v10 = vld [vmem:[#allocation22 + $0x318] sm:$0xff]  ;;  %v1689_v47 = vld [vmem:[#allocation22 + $0x308] sm:$0xff] }
 0x1a2   :  { %2543 = vmatpush3.msra.mxu0 %v1670_v57  ;;  %2578 = vmatpush3.msra.mxu1 %v1702_v58  ;;  %v764_v57 = vmul.f32 %v740_v30, %v3300_v55  ;;  %v1696_v58 = vld [vmem:[#allocation22 + $0x340] sm:$0xff]  ;;  %v858_v6 = vmul.f32 %v834_v50, %v3323_v13 }
 0x1a3   :  { %2544 = vmatprep.subr.mxu0 %v1685_v61  ;;  %2579 = vmatprep.subr.mxu1 %v1717_v63  ;;  %v853_v61 = vmul.f32 %v814_v18, %v3323_v13  ;;  %v1711_v63 = vld [vmem:[#allocation22 + $0x3b8] sm:$0xff]  ;;  %v868_v16 = vadd.f32 %v856_v3, %v774_v62  ;;  %v1676_v18 = vld [vmem:[#allocation22 + $0x2a0] sm:$0xff]  ;;  %v1750_v3 = vld [vmem:[#allocation22 + $0x4f0] sm:$0xff] }
 0x1a4   :  { %2545 = vmatpush3.msra.mxu0 %v1669_v0  ;;  %2580 = vmatpush3.msra.mxu1 %v1701_v1  ;;  %v1663_v0 = vld [vmem:[#allocation22 + $0x238] sm:$0xff]  ;;  %v776_v5 = vadd.f32 %v764_v57, %v682_v32  ;;  %v1672_v50 = vld [vmem:[#allocation22 + $0x280] sm:$0xff] }
 0x1a5   :  { %2546 = vmatprep.subr.mxu0 %v1684_v20  ;;  %2581 = vmatprep.subr.mxu1 %v1716_v4  ;;  %v1695_v1 = vld [vmem:[#allocation22 + $0x338] sm:$0xff]  ;;  %v1678_v20 = vld [vmem:[#allocation22 + $0x2b0] sm:$0xff]  ;;  %v865_v12 = vadd.f32 %v853_v61, %v771_v60  ;;  %v892_v30 = vmul.f32 0.01, %v868_v16  ;;  %vm880_vm12 = vcmp.gt.f32.partialorder %v868_v16, 0.0  ;;  %v1656_v57 = vld [vmem:[#allocation22 + $0x200] sm:$0xff] }
 0x1a6   :  { %2547 = vmatpush3.msra.mxu0 %v1668_v9  ;;  %2582 = vmatpush3.msra.mxu1 %v1700_v11  ;;  %v1710_v4 = vld [vmem:[#allocation22 + $0x3b0] sm:$0xff]  ;;  %v863_v11 = vadd.f32 %v851_v53, %v769_v59  ;;  %v1751_v59 = vld [vmem:[#allocation22 + $0x4f8] sm:$0xff] }
 0x1a7   :  { %2548 = vmatprep.subr.mxu0 %v1683_v14  ;;  %2583 = vmatprep.subr.mxu1 %v1715_v40  ;;  %v1694_v9 = vld [vmem:[#allocation22 + $0x330] sm:$0xff]  ;;  %v1661_v14 = vld [vmem:[#allocation22 + $0x228] sm:$0xff]  ;;  %v889_v24 = vmul.f32 0.01, %v865_v12  ;;  %vm877_vm11 = vcmp.gt.f32.partialorder %v865_v12, 0.0  ;;  %v904_v48 = vsel %vm880_vm12, %v868_v16, %v892_v30  ;;  %v1783_v60 = vld [vmem:[#allocation22 + $0x5f8] sm:$0xff] }
 0x1a8   :  { %2549 = vmatpush3.msra.mxu0 %v1667_v21  ;;  %2584 = vmatpush3.msra.mxu1 %v1699_v22  ;;  %v1693_v40 = vld [vmem:[#allocation22 + $0x328] sm:$0xff]  ;;  %v870_v21 = vadd.f32 %v858_v6, %v776_v5  ;;  %v1660_v22 = vld [vmem:[#allocation22 + $0x220] sm:$0xff]  ;;  %v887_v41 = vmul.f32 0.01, %v863_v11  ;;  %vm875_vm10 = vcmp.gt.f32.partialorder %v863_v11, 0.0  ;;  %vm916_vm1 = vcmp.gt.f32.partialorder %v904_v48, 0.0 }
 0x1a9   :  { %2550 = vmatprep.subr.mxu0 %v1682_v56  ;;  %2585 = vmatprep.subr.mxu1 %v1714_v27  ;;  %v1675_v56 = vld [vmem:[#allocation22 + $0x298] sm:$0xff]  ;;  %v1734_v6 = vld [vmem:[#allocation22 + $0x470] sm:$0xff] }
 0x1aa   :  { %2551 = vmatpush3.msra.mxu0 %v1666_v26  ;;  %2586 = vmatpush3.msra.mxu1 %v1698_v25  ;;  %v1707_v27 = vld [vmem:[#allocation22 + $0x398] sm:$0xff]  ;;  %v1674_v26 = vld [vmem:[#allocation22 + $0x290] sm:$0xff]  ;;  %v894_v37 = vmul.f32 0.01, %v870_v21  ;;  %vm882_vm13 = vcmp.gt.f32.partialorder %v870_v21, 0.0 }
 0x1ab   :  { %2552 = vmatprep.subr.mxu0 %v1681_v43  ;;  %2587 = vmatprep.subr.mxu1 %v1713_v44  ;;  %v1706_v25 = vld [vmem:[#allocation22 + $0x390] sm:$0xff]  ;;  %v899_v43 = vsel %vm875_vm10, %v863_v11, %v887_v41  ;;  %v901_v44 = vsel %vm877_vm11, %v865_v12, %v889_v24  ;;  %v1749_v11 = vld [vmem:[#allocation22 + $0x4e8] sm:$0xff]  ;;  %v736_v41 = vrot.slane %v3404_v7, %v3186_v36  ;;  %v1747_v24 = vld [vmem:[#allocation22 + $0x4d8] sm:$0xff] }
 0x1ac   :  { %2553 = vmatpush3.msra.mxu0 %v1665_v46  ;;  %2588 = vmatpush3.msra.mxu1 %v1697_v28  ;;  %v1705_v46 = vld [vmem:[#allocation22 + $0x388] sm:$0xff]  ;;  %v925_v53 = vmul.f32 0.01, %v901_v44  ;;  %v906_v32 = vsel %vm882_vm13, %v870_v21, %v894_v37  ;;  %vm911_vm14 = vcmp.gt.f32.partialorder %v899_v43, 0.0  ;;  %vm913_vm15 = vcmp.gt.f32.partialorder %v901_v44, 0.0  ;;  %v1764_v21 = vld [vmem:[#allocation22 + $0x560] sm:$0xff] }
 0x1ad   :  { %2554 = vmatprep.subr.mxu0 %v1680_v51  ;;  %2589 = vmatprep.subr.mxu1 %v1712_v52  ;;  %v1657_v28 = vld [vmem:[#allocation22 + $0x208] sm:$0xff]  ;;  %v1704_v51 = vld [vmem:[#allocation22 + $0x380] sm:$0xff]  ;;  %v923_v52 = vmul.f32 0.01, %v899_v43  ;;  %v930_v61 = vmul.f32 0.01, %v906_v32 }
 0x1ae   :  { %2555 = vmatpush3.msra.mxu0 %v1664_v33  ;;  %2590 = vmatpush3.msra.mxu1 %v1696_v58  ;;  %v1688_v33 = vld [vmem:[#allocation22 + $0x300] sm:$0xff]  ;;  %v928_v58 = vmul.f32 0.01, %v904_v48  ;;  %vm918_vm2 = vcmp.gt.f32.partialorder %v906_v32, 0.0  ;;  %v1781_v12 = vld [vmem:[#allocation22 + $0x5e8] sm:$0xff]  ;;  %v1778_v30 = vld [vmem:[#allocation22 + $0x5d0] sm:$0xff] }
 0x1af   :  { %2556 = vmatprep.subr.mxu0 %v1679_v34  ;;  %2591 = vmatprep.subr.mxu1 %v1711_v63  ;;  %v935_v34 = vsel %vm911_vm14, %v899_v43, %v923_v52  ;;  %v937_v63 = vsel %vm913_vm15, %v901_v44, %v925_v53  ;;  %v942_v5 = vsel %vm918_vm2, %v906_v32, %v930_v61  ;;  %v1745_v43 = vld [vmem:[#allocation22 + $0x4c8] sm:$0xff]  ;;  %v1775_v52 = vld [vmem:[#allocation22 + $0x5b8] sm:$0xff] }
 0x1b0   :  { %2557 = vmatpush3.msra.mxu0 %v1663_v0  ;;  %2592 = vmatpush3.msra.mxu1 %v1695_v1  ;;  %v1735_v0 = vld [vmem:[#allocation22 + $0x478] sm:$0xff]  ;;  %v940_v62 = vsel %vm916_vm1, %v904_v48, %v928_v58  ;;  %v1777_v44 = vld [vmem:[#allocation22 + $0x5c8] sm:$0xff]  ;;  %v1726_v58 = vld [vmem:[#allocation22 + $0x430] sm:$0xff] }
 0x1b1   :  { %2558 = vmatprep.subr.mxu0 %v1678_v20  ;;  %2593 = vmatprep.subr.mxu1 %v1710_v4  ;;  %v1767_v1 = vld [vmem:[#allocation22 + $0x578] sm:$0xff]  ;;  %v1782_v20 = vld [vmem:[#allocation22 + $0x5f0] sm:$0xff]  ;;  %v572_v4 = vrot.slane %v3385_v54, %v3183_v35 }
 0x1b2   :  { %2559 = vmatpush3.msra.mxu0 %v1662_v8  ;;  %2594 = vmatpush3.msra.mxu1 %v1694_v9  ;;  %v1766_v8 = vld [vmem:[#allocation22 + $0x570] sm:$0xff]  ;;  %v580_v9 = vrot.slane %v3385_v54, %v3186_v36  ;;  %v728_v54 = vrot.slane %v3404_v7, %v3183_v35  ;;  %v1727_v53 = vld [vmem:[#allocation22 + $0x438] sm:$0xff] }
 0x1b3   :  { %2560 = vmatprep.subr.mxu0 %v1677_v15  ;;  %2595 = vmatprep.subr.mxu1 %v1709_v17  ;;  %v1733_v15 = vld [vmem:[#allocation22 + $0x468] sm:$0xff]  ;;  %v605_v16 = vmul.f32 %v572_v4, %v3280_v39  ;;  %v1730_v7 = vld [vmem:[#allocation22 + $0x450] sm:$0xff]  ;;  %v1759_v32 = vld [vmem:[#allocation22 + $0x538] sm:$0xff] }
 0x1b4   :  { %2561 = vmatpush3.msra.mxu0 %v1661_v14  ;;  %2596 = vmatpush3.msra.mxu1 %v1693_v40  ;;  %v1765_v17 = vld [vmem:[#allocation22 + $0x568] sm:$0xff]  ;;  %v1748_v14 = vld [vmem:[#allocation22 + $0x4e0] sm:$0xff]  ;;  %v761_v37 = vmul.f32 %v728_v54, %v3300_v55 }
 0x1b5   :  { %2562 = vmatprep.subr.mxu0 %v1676_v18  ;;  %2597 = vmatprep.subr.mxu1 %v1708_v19  ;;  %v1780_v40 = vld [vmem:[#allocation22 + $0x5e0] sm:$0xff]  ;;  %v646_v18 = vrot.slane %v3396_v2, %v3183_v35  ;;  %v1769_v54 = vld [vmem:[#allocation22 + $0x588] sm:$0xff] }
 0x1b6   :  { %2563 = vmatpush3.msra.mxu0 %v1660_v22  ;;  %2598 = vmatpush3.msra.mxu1 %v1692_v49  ;;  %v1732_v19 = vld [vmem:[#allocation22 + $0x460] sm:$0xff]  ;;  %v607_v22 = vmul.f32 %v580_v9, %v3280_v39  ;;  %v654_v49 = vrot.slane %v3396_v2, %v3186_v36  ;;  %v822_v39 = vrot.slane %v3421_v23, %v3183_v35  ;;  %v1761_v35 = vld [vmem:[#allocation22 + $0x548] sm:$0xff]  ;;  %v1723_v9 = vld [vmem:[#allocation22 + $0x418] sm:$0xff] }
 0x1b7   :  { %2564 = vmatprep.subr.mxu0 %v1675_v56  ;;  %2599 = vmatprep.subr.mxu1 %v1707_v27  ;;  %v1779_v56 = vld [vmem:[#allocation22 + $0x5d8] sm:$0xff]  ;;  %v830_v2 = vrot.slane %v3421_v23, %v3186_v36  ;;  %v1744_v36 = vld [vmem:[#allocation22 + $0x4c0] sm:$0xff] }
 0x1b8   :  { %2565 = vmatpush3.msra.mxu0 %v1659_v29  ;;  %2600 = vmatpush3.msra.mxu1 %v1691_v10  ;;  %v1731_v27 = vld [vmem:[#allocation22 + $0x458] sm:$0xff]  ;;  %v1746_v10 = vld [vmem:[#allocation22 + $0x4d0] sm:$0xff]  ;;  %v1776_v23 = vld [vmem:[#allocation22 + $0x5c0] sm:$0xff] }
 0x1b9   :  { %2566 = vmatprep.subr.mxu0 %v1674_v26  ;;  %2601 = vmatprep.subr.mxu1 %v1706_v25  ;;  %v1763_v29 = vld [vmem:[#allocation22 + $0x558] sm:$0xff]  ;;  %v679_v26 = vadd.f32 %v646_v18, %v605_v16  ;;  %v1762_v25 = vld [vmem:[#allocation22 + $0x550] sm:$0xff]  ;;  %v1737_v18 = vld [vmem:[#allocation22 + $0x488] sm:$0xff] }
 0x1ba   :  { %2567 = vmatpush3.msra.mxu0 %v1658_v38  ;;  %2602 = vmatpush3.msra.mxu1 %v1690_v42  ;;  %v681_v38 = vadd.f32 %v654_v49, %v607_v22  ;;  %v763_v42 = vmul.f32 %v736_v41, %v3300_v55  ;;  %v1736_v22 = vld [vmem:[#allocation22 + $0x480] sm:$0xff] }
 0x1bb   :  { %2568 = vmatprep.subr.mxu0 %v1673_v45  ;;  %2603 = vmatprep.subr.mxu1 %v1705_v46  ;;  %v1729_v45 = vld [vmem:[#allocation22 + $0x448] sm:$0xff]  ;;  %v855_v46 = vmul.f32 %v822_v39, %v3323_v13  ;;  %v773_v48 = vadd.f32 %v761_v37, %v679_v26  ;;  %v1768_v49 = vld [vmem:[#allocation22 + $0x580] sm:$0xff] }
 0x1bc   :  { %2569 = vmatpush3.msra.mxu0 %v1657_v28  ;;  %2604 = vmatpush3.msra.mxu1 %v1689_v47  ;;  %v1728_v28 = vld [vmem:[#allocation22 + $0x440] sm:$0xff]  ;;  %v775_v55 = vadd.f32 %v763_v42, %v681_v38 }
 0x1bd   :  { %2570 = vmatprep.subr.mxu0 %v1672_v50  ;;  %2605 = vmatprep.subr.mxu1 %v1704_v51  ;;  %v1760_v47 = vld [vmem:[#allocation22 + $0x540] sm:$0xff]  ;;  %v857_v50 = vmul.f32 %v830_v2, %v3323_v13  ;;  %v1743_v51 = vld [vmem:[#allocation22 + $0x4b8] sm:$0xff]  ;;  %v1741_v13 = vld [vmem:[#allocation22 + $0x4a8] sm:$0xff] }
 0x1be   :  { %2571 = vmatpush3.msra.mxu0 %v1656_v57  ;;  %2606 = vmatpush3.msra.mxu1 %v1688_v33  ;;  %v1742_v57 = vld [vmem:[#allocation22 + $0x4b0] sm:$0xff] }
 0x1bf   :  { %1989 = vmatmul.mubr.f32.vlgmr.msra.gmra.mxu0 %v935_v34  ;;  %2059 = vmatmul.mubr.f32.vlgmr.msra.gmra.mxu1 %v937_v63  ;;  %v1774_v33 = vld [vmem:[#allocation22 + $0x5b0] sm:$0xff]  ;;  %v869_v61 = vadd.f32 %v857_v50, %v775_v55  ;;  %v1773_v34 = vld [vmem:[#allocation22 + $0x5a8] sm:$0xff] }
 0x1c0   :  { %2610 = vmatprep.subr.mxu0 %v1751_v59  ;;  %2645 = vmatprep.subr.mxu1 %v1783_v60  ;;  %v1758_v59 = vld [vmem:[#allocation22 + $0x530] sm:$0xff]  ;;  %v867_v60 = vadd.f32 %v855_v46, %v773_v48  ;;  %v1725_v63 = vld [vmem:[#allocation22 + $0x428] sm:$0xff] }
 0x1c1   :  { %2611 = vmatpush3.msra.mxu0 %v1735_v0  ;;  %2128 = vmatprep.mubr.f32.mxu0 %v940_v62  ;;  %v1757_v0 = vld [vmem:[#allocation22 + $0x528] sm:$0xff]  ;;  %v1772_v62 = vld [vmem:[#allocation22 + $0x5a0] sm:$0xff]  ;;  %vm881_vm4 = vcmp.gt.f32.partialorder %v869_v61, 0.0 }
 0x1c2   :  { %2646 = vmatpush3.msra.mxu1 %v1767_v1  ;;  %2198 = vmatprep.mubr.f32.mxu1 %v942_v5  ;;  %v1740_v1 = vld [vmem:[#allocation22 + $0x4a0] sm:$0xff]  ;;  %v891_v4 = vmul.f32 0.01, %v867_v60  ;;  %v893_v5 = vmul.f32 0.01, %v869_v61  ;;  %vm879_vm3 = vcmp.gt.f32.partialorder %v867_v60, 0.0 }
 0x1c3   :  { %2612 = vmatprep.subr.mxu0 %v1750_v3  ;;  %2647 = vmatprep.subr.mxu1 %v1782_v20  ;;  %v1724_v3 = vld [vmem:[#allocation22 + $0x420] sm:$0xff] }
 0x1c4   :  { %2613 = vmatpush3.msra.mxu0 %v1734_v6  ;;  %2648 = vmatpush3.msra.mxu1 %v1766_v8  ;;  %v1756_v20 = vld [vmem:[#allocation22 + $0x520] sm:$0xff]  ;;  %v1739_v6 = vld [vmem:[#allocation22 + $0x498] sm:$0xff]  ;;  %v905_v16 = vsel %vm881_vm4, %v869_v61, %v893_v5 }
 0x1c5   :  { %2614 = vmatprep.subr.mxu0 %v1749_v11  ;;  %2649 = vmatprep.subr.mxu1 %v1781_v12  ;;  %v1771_v8 = vld [vmem:[#allocation22 + $0x598] sm:$0xff]  ;;  %v1738_v12 = vld [vmem:[#allocation22 + $0x490] sm:$0xff]  ;;  %vm917_vm6 = vcmp.gt.f32.partialorder %v905_v16, 0.0 }
 0x1c6   :  { %2615 = vmatpush3.msra.mxu0 %v1733_v15  ;;  %2650 = vmatpush3.msra.mxu1 %v1765_v17  ;;  %v1755_v11 = vld [vmem:[#allocation22 + $0x518] sm:$0xff]  ;;  %v1770_v15 = vld [vmem:[#allocation22 + $0x590] sm:$0xff] }
 0x1c7   :  { %2616 = vmatprep.subr.mxu0 %v1748_v14  ;;  %2651 = vmatprep.subr.mxu1 %v1780_v40  ;;  %v1722_v17 = vld [vmem:[#allocation22 + $0x410] sm:$0xff]  ;;  %v903_v40 = vsel %vm879_vm3, %v867_v60, %v891_v4 }
 0x1c8   :  { %2617 = vmatpush3.msra.mxu0 %v1732_v19  ;;  %2652 = vmatpush3.msra.mxu1 %v1764_v21  ;;  %v1754_v14 = vld [vmem:[#allocation22 + $0x510] sm:$0xff]  ;;  %v1721_v19 = vld [vmem:[#allocation22 + $0x408] sm:$0xff]  ;;  %v927_v41 = vmul.f32 0.01, %v903_v40  ;;  %vm915_vm5 = vcmp.gt.f32.partialorder %v903_v40, 0.0 }
 0x1c9   :  { %2618 = vmatprep.subr.mxu0 %v1747_v24  ;;  %2653 = vmatprep.subr.mxu1 %v1779_v56  ;;  %v1753_v21 = vld [vmem:[#allocation22 + $0x508] sm:$0xff]  ;;  %v929_v24 = vmul.f32 0.01, %v905_v16  ;;  %v1720_v56 = vld [vmem:[#allocation22 + $0x400] sm:$0xff] }
 0x1ca   :  { %2619 = vmatpush3.msra.mxu0 %v1731_v27  ;;  %2654 = vmatpush3.msra.mxu1 %v1763_v29  ;;  %v1752_v27 = vld [vmem:[#allocation22 + $0x500] sm:$0xff]  ;;  %v939_v29 = vsel %vm915_vm5, %v903_v40, %v927_v41 }
 0x1cb   :  { %2620 = vmatprep.subr.mxu0 %v1746_v10  ;;  %2655 = vmatprep.subr.mxu1 %v1778_v30  ;;  %v941_v10 = vsel %vm917_vm6, %v905_v16, %v929_v24 }
 0x1cc   :  { %2621 = vmatpush3.msra.mxu0 %v1730_v7  ;;  %2656 = vmatpush3.msra.mxu1 %v1762_v25 }
 0x1cd   :  { %2622 = vmatprep.subr.mxu0 %v1745_v43  ;;  %2657 = vmatprep.subr.mxu1 %v1777_v44 }
 0x1ce   :  { %2623 = vmatpush3.msra.mxu0 %v1729_v45  ;;  %2658 = vmatpush3.msra.mxu1 %v1761_v35 }
 0x1cf   :  { %2624 = vmatprep.subr.mxu0 %v1744_v36  ;;  %2659 = vmatprep.subr.mxu1 %v1776_v23 }
 0x1d0   :  { %2625 = vmatpush3.msra.mxu0 %v1728_v28  ;;  %2660 = vmatpush3.msra.mxu1 %v1760_v47 }
 0x1d1   :  { %2626 = vmatprep.subr.mxu0 %v1743_v51  ;;  %2661 = vmatprep.subr.mxu1 %v1775_v52 }
 0x1d2   :  { %2627 = vmatpush3.msra.mxu0 %v1727_v53  ;;  %2662 = vmatpush3.msra.mxu1 %v1759_v32 }
 0x1d3   :  { %2628 = vmatprep.subr.mxu0 %v1742_v57  ;;  %2663 = vmatprep.subr.mxu1 %v1774_v33 }
 0x1d4   :  { %2629 = vmatpush3.msra.mxu0 %v1726_v58  ;;  %2664 = vmatpush3.msra.mxu1 %v1758_v59 }
 0x1d5   :  { %2630 = vmatprep.subr.mxu0 %v1741_v13  ;;  %2665 = vmatprep.subr.mxu1 %v1773_v34 }
 0x1d6   :  { %2631 = vmatpush3.msra.mxu0 %v1725_v63  ;;  %2666 = vmatpush3.msra.mxu1 %v1757_v0 }
 0x1d7   :  { %2632 = vmatprep.subr.mxu0 %v1740_v1  ;;  %2667 = vmatprep.subr.mxu1 %v1772_v62 }
 0x1d8   :  { %2633 = vmatpush3.msra.mxu0 %v1724_v3  ;;  %2668 = vmatpush3.msra.mxu1 %v1756_v20 }
 0x1d9   :  { %2634 = vmatprep.subr.mxu0 %v1739_v6  ;;  %2669 = vmatprep.subr.mxu1 %v1771_v8 }
 0x1da   :  { %2635 = vmatpush3.msra.mxu0 %v1723_v9  ;;  %2670 = vmatpush3.msra.mxu1 %v1755_v11 }
 0x1db   :  { %2636 = vmatprep.subr.mxu0 %v1738_v12  ;;  %2671 = vmatprep.subr.mxu1 %v1770_v15  ;;  %v2259_v15 = vld [vmem:[%s3491_s16] ss:$0 sm:$0xff]  ;;  %s3021_s16 = smov [#allocation23]  }
 0x1dc   :  { %2637 = vmatpush3.msra.mxu0 %v1722_v17  ;;  %2672 = vmatpush3.msra.mxu1 %v1754_v14  ;;  %v2217_v14 = vand.u32 127, %v237_v31  ;;  %s2239_s23 = sshll.u32 %s3021_s16, 4  ;;  %s2240_s23 = int_to_ptr.vmem [resolvable:$true] %s2239_s23 }
 0x1dd   :  { %2638 = vmatprep.subr.mxu0 %v1737_v18  ;;  %2673 = vmatprep.subr.mxu1 %v1769_v54  ;;  %s2967_s24 = scalar_lea.vmem %s2240_s23, 32  ;;  %p2972_p10 = scmp.lt.s32.totalorder %s2240_s23, %s2240_s23 }
 0x1de   :  { %2639 = vmatpush3.msra.mxu0 %v1721_v19  ;;  %2674 = vmatpush3.msra.mxu1 %v1753_v21  ;;  %vm2218_vm8 = vcmp.lt.s32.totalorder %v2217_v14, 8  ;;  %p2968_p9 = scmp.ne.s32.totalorder %s2240_s23, %s2967_s24  ;;  %p2973_p11 = scmp.lt.s32.totalorder %s2967_s24, %s2967_s24 }
 0x1df   :  { %2640 = vmatprep.subr.mxu0 %v1736_v22  ;;  %2675 = vmatprep.subr.mxu1 %v1768_v49 }
 0x1e0   :  { %2641 = vmatpush3.msra.mxu0 %v1720_v56  ;;  %2676 = vmatpush3.msra.mxu1 %v1752_v27  ;;  %p2974_p12 = por %p2973_p11, %p2972_p10 }
 0x1e1   :  { %2129 = vmatmul.mubr.f32.vlgmr.msra.gmra.mxu0 %v939_v29  ;;  %2199 = vmatmul.mubr.f32.vlgmr.msra.gmra.mxu1 %v941_v10 }
 0x1e2   :  { %p2975_p13 = pnand %p2974_p12, %p2968_p9 }
 0x1f8   :  { %v2292_v30 = vpop.f32.mrf.mxu0  ;;  %v2327_v26 = vpop.f32.mrf.mxu1 }
 0x1fa   :  { %v2293_v39 = vpop.f32.mrf.mxu0  ;;  %v2328_v7 = vpop.f32.mrf.mxu1 }
 0x1fb   :  { %v2294_v51 = vadd.f32 %v2293_v39, %v2292_v30  ;;  %v2329_v52 = vadd.f32 %v2328_v7, %v2327_v26 }
 0x1fd   :  { %v1232_v58 = vadd.f32 %v2329_v52, %v2294_v51 }
 0x219   :  { %v2362_v2 = vpop.f32.mrf.mxu0  ;;  %v2397_v25 = vpop.f32.mrf.mxu1 }
 0x21b   :  { %v2363_v37 = vpop.f32.mrf.mxu0  ;;  %v2398_v42 = vpop.f32.mrf.mxu1 }
 0x21c   :  { %v2364_v32 = vadd.f32 %v2363_v37, %v2362_v2  ;;  %v2399_v3 = vadd.f32 %v2398_v42, %v2397_v25 }
 0x21e   :  { %v1302_v63 = vadd.f32 %v2364_v32, %v1232_v58 }
 0x220   :  { %v1372_v6 = vadd.f32 %v2399_v3, %v1302_v63 }
 0x23b   :  { %v2432_v38 = vpop.f32.mrf.mxu0  ;;  %v2467_v43 = vpop.f32.mrf.mxu1 }
 0x23d   :  { %v2433_v44 = vpop.f32.mrf.mxu0  ;;  %v2468_v35 = vpop.f32.mrf.mxu1 }
 0x23e   :  { %v2434_v59 = vadd.f32 %v2433_v44, %v2432_v38  ;;  %v2469_v60 = vadd.f32 %v2468_v35, %v2467_v43 }
 0x240   :  { %v1588_v20 = vadd.f32 %v2469_v60, %v2434_v59 }
 0x242   :  { %v1591_v11 = vadd.f32 %v1588_v20, %v1372_v6 }
 0x25d   :  { %v2502_v45 = vpop.f32.mrf.mxu0  ;;  %v2537_v36 = vpop.f32.mrf.mxu1 }
 0x25f   :  { %v2503_v23 = vpop.f32.mrf.mxu0  ;;  %v2538_v28 = vpop.f32.mrf.mxu1 }
 0x260   :  { %v2504_v48 = vadd.f32 %v2503_v23, %v2502_v45  ;;  %v2539_v55 = vadd.f32 %v2538_v28, %v2537_v36 }
 0x262   :  { %v1921_v57 = vadd.f32 %v2539_v55, %v2504_v48 }
 0x27f   :  { %v2572_v46 = vpop.f32.mrf.mxu0  ;;  %v2607_v50 = vpop.f32.mrf.mxu1 }
 0x281   :  { %v2573_v47 = vpop.f32.mrf.mxu0  ;;  %v2608_v33 = vpop.f32.mrf.mxu1 }
 0x282   :  { %v2574_v53 = vadd.f32 %v2573_v47, %v2572_v46  ;;  %v2609_v0 = vadd.f32 %v2608_v33, %v2607_v50 }
 0x284   :  { %v1991_v61 = vadd.f32 %v2574_v53, %v1921_v57 }
 0x286   :  { %v2061_v4 = vadd.f32 %v2609_v0, %v1991_v61 }
 0x2a1   :  { %v2642_v13 = vpop.f32.mrf.mxu0  ;;  %v2677_v34 = vpop.f32.mrf.mxu1 }
 0x2a3   :  { %v2643_v1 = vpop.f32.mrf.mxu0  ;;  %v2678_v62 = vpop.f32.mrf.mxu1 }
 0x2a4   :  { %v2644_v5 = vadd.f32 %v2643_v1, %v2642_v13  ;;  %v2679_v9 = vadd.f32 %v2678_v62, %v2677_v34 }
 0x2a6   :  { %v2131_v8 = vadd.f32 %v2644_v5, %v2061_v4 }
 0x2a8   :  { %v2201_v12 = vadd.f32 %v2679_v9, %v2131_v8 }
 0x2aa   :  { %v2204_v17 = vadd.f32 %v2201_v12, %v1591_v11 }
 0x2ac   :  { %v2212_v40 = vadd.f32 %v2259_v15, %v2204_v17 }
 0x2ae   :  { %vm2213_vm7 = vcmp.gt.f32.partialorder %v2212_v40, 0.0  ;;  %v2214_v16 = vmul.f32 0.01, %v2212_v40 }
 0x2b0   :  { %v2215_v18 = vsel %vm2213_vm7, %v2212_v40, %v2214_v16 }
 0x2b1   :  { %v2219_v54 = vsel %vm2218_vm8, %v2215_v18, -1e+30 }
 0x2b2   :  { %v2220_v19 = vsel %vm228_vm0, %v2219_v54, -inf }
 0x2b3   :  { %2221 = vmax.xlane.f32.xlu1 %v2220_v19 }
 0x33c   :  { %v2222_v21 = vpop.xlane.xlu1 %2221 }
 0x33d   :  { %v2223_v22 = vsub.f32 %v2219_v54, %v2222_v21 }
 0x33f   :  { %v2224_v49 = vmul.f32 1.442695, %v2223_v22 }
 0x341   :  { %2703 = vpow2.f32 %v2224_v49 }
 0x34e   :  { %v2704_v41 = vpop.eup %2703 }
 0x34f   :  { %v2226_v24 = vsel %vm2218_vm8, %v2704_v41, 0.0 }
 0x350   :  { %v2227_v56 = vsel %vm228_vm0, %v2226_v24, 0.0 }
 0x351   :  { %2228 = vadd.xlane.f32.xlu0 %v2227_v56 }
 0x3da   :  { %v2229_v27 = vpop.xlane.xlu0 %2228 }
 0x3db   :  { %2705 = vrcp.f32 %v2229_v27 }
 0x3e8   :  { %v2706_v31 = vpop.eup %2705 }
 0x3e9   :  { %v2231_v29 = vmul.f32 %v2706_v31, %v2226_v24 }
 0x3eb   :  { %2232 = vst [vmem:[#allocation23] sm:$0x3] %v2231_v29 }
 0x3ec   :  { %2978 = shalt.err (!%p2975_p13)
}
 0x3ed   :  { %2242 = dma.vmem_to_hbm [thread:$0]  %s2240_s23, 32, %s3492_s17, [#allocation4]  }
 0x3ee   :  { %3001 = dma.done.wait [#allocation4], 32  }
 0x3ef   :  { %3002 = vsyncadd [#allocation4], 4294967264 }
 0x3f0   :  { %2246 = vsyncpa [#allocation3], 1 }
 0x3f1   :  { %2247 = vsyncpa [#allocation6], 1 }
 0x3f2   :  { %2248 = vsyncpa [#allocation9], 1 }
 0x3f3   :  { %2249 = vsyncpa [#allocation12], 1 }
 0x3f4   :  { %2250 = vsyncpa [#allocation15], 1 }
 0x3f5   :  { %2251 = vsyncpa [#allocation18], 1 }
 0x3f6   :  { %2252 = vsyncpa [#allocation21], 1 }
 0x3f7   :  { %2253 = vsyncpa [#allocation4], 1 }

</bundles_post_ra>
